<compile_context>
chip_gen: v7x
topology: tpu7x:2x2x1
jax: 0.10.0
libtpu: 0.0.40
codegen_flags: <defaults>
</compile_context>

<pallas_src>
import math

import jax
import jax.numpy as jnp
from jax.experimental import pallas as pl
from jax.experimental.pallas import tpu as pltpu


# ----------------------------- configuration --------------------------------
E_TRUE = 50                # embed_size
HEADS = 5                  # nb_heads
D_TRUE = E_TRUE // HEADS   # 10 (head_dim)
HID_TRUE = 4 * E_TRUE      # 200 (forward_expansion * embed_size)

EP = 128                   # lane-padded embed dim
DP = 128                   # lane-aligned padded per-head dim (head h -> lanes h*128..)
HID_P = 256                # lane-padded FFN hidden dim

LN_EPS = 1e-5
NEG = -1e30                # additive mask value for cross-sequence entries


# ------------------------------- the kernel ---------------------------------
def transformer_block_kernel(
    v_ref, k_ref, q_ref,        # (RB, EP) bf16 flattened rows, zero-padded lanes
    mask_ref,                   # (RB, RB) f32 additive block-diagonal mask (0 / NEG)
    proj_ref,                   # (3, EP, HEADS*DP) bf16 block-diag Wv^T, Wk^T, Wq^T*scale
    wc_ref,                     # (HEADS*DP, EP)    bf16 per-head-stacked Wc^T
    w1_ref,                     # (EP, HID_P)       bf16 W1^T (padded)
    w2_ref,                     # (HID_P, EP)       bf16 W2^T (padded)
    c_ref,                      # (8, HID_P) f32 packed: bc, gA, bA, b1, b2, gB, bB, feat
    o_ref,                      # (RB, EP) f32
):
    f32 = jnp.float32
    bf16 = jnp.bfloat16

    xv = v_ref[...]
    xk = k_ref[...]
    xq = q_ref[...]

    # ---- fused per-head projections (weights pre-packed, bf16 MXU) ----
    v_all = jnp.dot(xv, proj_ref[0], preferred_element_type=f32).astype(bf16)
    k_all = jnp.dot(xk, proj_ref[1], preferred_element_type=f32).astype(bf16)
    q_all = jnp.dot(xq, proj_ref[2], preferred_element_type=f32).astype(bf16)

    amask = mask_ref[...]       # additive mask, precomputed in the wrapper

    # ---- multi-head attention; per-head outputs collected then one Wc matmul ----
    # (static 5-way unroll; fine at rb<=256 — see review note on fori_loop)
    av_tiles = []
    for h in range(HEADS):
        lo = h * DP
        qh = q_all[:, lo:lo + DP]          # lane-tile aligned slices (no relayout)
        kh = k_all[:, lo:lo + DP]
        vh = v_all[:, lo:lo + DP]

        # q @ k^T via trans-B dot_general (no XLU transpose of k)
        s = jax.lax.dot_general(qh, kh, (((1,), (1,)), ((), ())),
                                preferred_element_type=f32)        # (rb, rb)
        s = s + amask
        m = jnp.max(s, axis=-1, keepdims=True)
        e = jnp.exp(s - m)
        p = e * pl.reciprocal(jnp.sum(e, axis=-1, keepdims=True), approx=True)

        av = jnp.dot(p.astype(bf16), vh, preferred_element_type=f32)  # (rb, DP)
        av_tiles.append(av.astype(bf16))

    av_cat = jnp.concatenate(av_tiles, axis=-1)                    # (rb, HEADS*DP)
    attn = jnp.dot(av_cat, wc_ref[...], preferred_element_type=f32)  # (rb, EP)

    # ---- packed small constants ----
    c = c_ref[...]
    bc = c[0:1, :EP]
    gA = c[1:2, :EP]
    bA = c[2:3, :EP]
    b1 = c[3:4, :]              # (1, HID_P)
    b2 = c[4:5, :EP]
    gB = c[5:6, :EP]
    bB = c[6:7, :EP]
    fmask = c[7:8, :EP]         # 1.0 for true features (lanes < 50), else 0.0

    # LayerNorm over the true 50 features only (padded lanes stay exactly 0)
    inv_e = 1.0 / float(E_TRUE)

    def layer_norm(x, gamma, beta):
        mu = jnp.sum(x, axis=-1, keepdims=True) * inv_e
        cent = (x - mu) * fmask
        var = jnp.sum(cent * cent, axis=-1, keepdims=True) * inv_e   # biased (PyTorch)
        return cent * jax.lax.rsqrt(var + LN_EPS) * gamma + beta

    # ---- residual + LayerNorm A ----
    x1 = layer_norm(attn + bc + xq.astype(f32), gA, bA)

    # ---- feed forward ----
    hid = jnp.maximum(
        jnp.dot(x1.astype(bf16), w1_ref[...], preferred_element_type=f32) + b1, 0.0)
    ff = jnp.dot(hid.astype(bf16), w2_ref[...], preferred_element_type=f32) + b2

    # ---- residual + LayerNorm B (dropout = identity in eval) ----
    out = layer_norm(ff + x1, gB, bB)
    o_ref[...] = out.astype(o_ref.dtype)


# -------------------------- parameter pre-packing ----------------------------
def prepare_params(p):
    """One-time packing / transposing / bf16-casting of PyTorch-layout weights."""
    f32 = jnp.float32
    bf16 = jnp.bfloat16
    scale = 1.0 / math.sqrt(float(E_TRUE))   # prdc / embed_size**(1/2)

    def block_diag(w, s=1.0):
        # w: (D_TRUE, D_TRUE) nn.Linear weight (out,in); build x @ W^T for all
        # heads at once, routing head h input lanes h*10.. to output lanes h*128..
        wt = w.T.astype(f32) * s
        m = jnp.zeros((EP, HEADS * DP), f32)
        for h in range(HEADS):
            m = m.at[h * D_TRUE:(h + 1) * D_TRUE,
                     h * DP:h * DP + D_TRUE].set(wt)
        return m

    proj = jnp.stack(
        [block_diag(p["wv"]), block_diag(p["wk"]), block_diag(p["wq"], scale)],
        axis=0).astype(bf16)                                      # (3, EP, H*DP)

    # fc_concat^T stacked per head along rows: row block h*DP.. receives head h.
    wcT = p["wc"].T.astype(f32)                                   # (E, E)
    wc = jnp.zeros((HEADS * DP, EP), f32)
    for h in range(HEADS):
        wc = wc.at[h * DP:h * DP + D_TRUE, :E_TRUE].set(
            wcT[h * D_TRUE:(h + 1) * D_TRUE, :])
    wc = wc.astype(bf16)

    w1T = jnp.zeros((EP, HID_P), f32).at[:E_TRUE, :HID_TRUE].set(p["w1"].T).astype(bf16)
    w2T = jnp.zeros((HID_P, EP), f32).at[:HID_TRUE, :E_TRUE].set(p["w2"].T).astype(bf16)

    c = jnp.zeros((8, HID_P), f32)
    c = c.at[0, :E_TRUE].set(p["bc"])
    c = c.at[1, :E_TRUE].set(p["gA"])
    c = c.at[2, :E_TRUE].set(p["bA"])
    c = c.at[3, :HID_TRUE].set(p["b1"])
    c = c.at[4, :E_TRUE].set(p["b2"])
    c = c.at[5, :E_TRUE].set(p["gB"])
    c = c.at[6, :E_TRUE].set(p["bB"])
    c = c.at[7, :E_TRUE].set(1.0)        # LayerNorm feature mask

    return {"proj": proj, "wc": wc, "w1T": w1T, "w2T": w2T, "consts": c}


# ------------------------------- the wrapper ---------------------------------
def _round_up(x, m):
    return ((x + m - 1) // m) * m


def _chip_policy():
    """(is_v7x, target rows-per-step) — chip-aware grid policy."""
    kind = ""
    try:
        kind = jax.devices()[0].device_kind.lower()
    except Exception:
        pass
    is_v7 = "v7" in kind
    target_rows = 256 if ("v6" in kind or "v7" in kind) else 128
    return is_v7, target_rows


@jax.jit
def transformer_block(v, k, q, prep):
    """v, k, q: (N, S, 50) float32. Returns (N, S, 50) float32."""
    N, S, E = q.shape
    assert E == E_TRUE and v.shape == q.shape and k.shape == q.shape

    is_v7, target_rows = _chip_policy()

    # batch elements per grid step: rb = nb*S rows, (nb*S) % 8 == 0.
    unit = 8 // math.gcd(S, 8)
    nb = max(1, target_rows // S)
    if is_v7 and N >= 2:
        nb = min(nb, _round_up(N, 2) // 2)     # keep >= 2 parallel steps (2 TCs)
    nb = min(nb, _round_up(N, unit))           # never pad the batch past one step
    nb = max(unit, _round_up(nb, unit))
    n_pad = _round_up(N, nb)
    rows = n_pad * S
    rb = nb * S

    def to2d(x):
        x2 = x.reshape(N * S, E)
        return jnp.pad(x2, ((0, rows - N * S), (0, EP - E))).astype(jnp.bfloat16)

    v2, k2, q2 = to2d(v), to2d(k), to2d(q)

    # additive block-diagonal mask: rows attend only within their own sequence
    seg = jnp.arange(rb, dtype=jnp.int32) // S
    amask = jnp.where(seg[:, None] == seg[None, :], 0.0, NEG).astype(jnp.float32)

    row_spec = pl.BlockSpec((rb, EP), lambda i: (i, 0))
    mask_spec = pl.BlockSpec((rb, rb), lambda i: (0, 0))

    def const_spec(shape):
        nd = len(shape)
        return pl.BlockSpec(shape, lambda i, _nd=nd: (0,) * _nd)

    grid_spec = pltpu.PrefetchScalarGridSpec(
        num_scalar_prefetch=0,
        grid=(rows // rb,),
        in_specs=[
            row_spec, row_spec, row_spec,                 # v, k, q rows (bf16)
            mask_spec,                                    # additive attention mask
            const_spec((3, EP, HEADS * DP)),              # packed projections
            const_spec((HEADS * DP, EP)),                 # stacked Wc^T
            const_spec((EP, HID_P)),                      # W1^T
            const_spec((HID_P, EP)),                      # W2^T
            const_spec((8, HID_P)),                       # packed biases / LN params
        ],
        out_specs=row_spec,
    )

    fn = pl.pallas_call(
        transformer_block_kernel,
        out_shape=jax.ShapeDtypeStruct((rows, EP), jnp.float32),
        grid_spec=grid_spec,
        compiler_params=pltpu.CompilerParams(
            dimension_semantics=("parallel",),
        ),
    )

    out2 = fn(v2, k2, q2, amask, prep["proj"], prep["wc"],
              prep["w1T"], prep["w2T"], prep["consts"])
    return out2[:N * S, :E].reshape(N, S, E)


# --------------------------- deterministic params ----------------------------
def make_params(key):
    ks = jax.random.split(key, 12)
    f32 = jnp.float32
    return {
        "wv": 0.1 * jax.random.normal(ks[0], (D_TRUE, D_TRUE), f32),
        "wk": 0.1 * jax.random.normal(ks[1], (D_TRUE, D_TRUE), f32),
        "wq": 0.1 * jax.random.normal(ks[2], (D_TRUE, D_TRUE), f32),
        "wc": 0.1 * jax.random.normal(ks[3], (E_TRUE, E_TRUE), f32),
        "bc": 0.1 * jax.random.normal(ks[4], (E_TRUE,), f32),
        "gA": 1.0 + 0.05 * jax.random.normal(ks[5], (E_TRUE,), f32),
        "bA": 0.05 * jax.random.normal(ks[6], (E_TRUE,), f32),
        "w1": 0.1 * jax.random.normal(ks[7], (HID_TRUE, E_TRUE), f32),
        "b1": 0.1 * jax.random.normal(ks[8], (HID_TRUE,), f32),
        "w2": 0.1 * jax.random.normal(ks[9], (E_TRUE, HID_TRUE), f32),
        "b2": 0.1 * jax.random.normal(ks[10], (E_TRUE,), f32),
        "gB": 1.0 + 0.05 * jax.random.normal(ks[11], (E_TRUE,), f32),
        "bB": jnp.zeros((E_TRUE,), f32),
    }


# ------------------------------------ main -----------------------------------
if __name__ == "__main__":
    key = jax.random.PRNGKey(0)
    k_params, k_v, k_k, k_q = jax.random.split(key, 4)

    N, S = 2, 8   # small batch / sequence; embed_size fixed at 50 by the module
    v = jax.random.normal(k_v, (N, S, E_TRUE), jnp.float32)
    k = jax.random.normal(k_k, (N, S, E_TRUE), jnp.float32)
    q = jax.random.normal(k_q, (N, S, E_TRUE), jnp.float32)

    params = make_params(k_params)
    prep = prepare_params(params)

    out = transformer_block(v, k, q, prep)
    jax.block_until_ready(out)
    assert out.shape == (N, S, E_TRUE)
    assert bool(jnp.all(jnp.isfinite(out)))
    print("KERNEL_OK")
</pallas_src>

<mosaic_0001>
module attributes {stable_mosaic.version = 11 : i64} {
  func.func @transformer_block_kernel(%arg0: i32, %arg1: memref<16x128xbf16, #tpu.memory_space<vmem>>, %arg2: memref<16x128xbf16, #tpu.memory_space<vmem>>, %arg3: memref<16x128xbf16, #tpu.memory_space<vmem>>, %arg4: memref<16x16xf32, #tpu.memory_space<vmem>>, %arg5: memref<3x128x640xbf16, #tpu.memory_space<vmem>>, %arg6: memref<640x128xbf16, #tpu.memory_space<vmem>>, %arg7: memref<128x256xbf16, #tpu.memory_space<vmem>>, %arg8: memref<256x128xbf16, #tpu.memory_space<vmem>>, %arg9: memref<8x256xf32, #tpu.memory_space<vmem>>, %arg10: memref<16x128xf32, #tpu.memory_space<vmem>>) attributes {dimension_semantics = [#tpu.dimension_semantics<parallel>], iteration_bounds = array<i64: 1>, scalar_prefetch = 0 : i64, scratch_operands = 0 : i64, tpu.core_type = #tpu.core_type<tc>, window_params = [{transform_indices = @transform_0, window_bounds = array<i64: 16, 128>}, {transform_indices = @transform_1, window_bounds = array<i64: 16, 128>}, {transform_indices = @transform_2, window_bounds = array<i64: 16, 128>}, {pipeline_mode = #tpu.pipeline_mode<synchronous>, transform_indices = @transform_3, window_bounds = array<i64: 16, 16>}, {pipeline_mode = #tpu.pipeline_mode<synchronous>, transform_indices = @transform_4, window_bounds = array<i64: 3, 128, 640>}, {pipeline_mode = #tpu.pipeline_mode<synchronous>, transform_indices = @transform_5, window_bounds = array<i64: 640, 128>}, {pipeline_mode = #tpu.pipeline_mode<synchronous>, transform_indices = @transform_6, window_bounds = array<i64: 128, 256>}, {pipeline_mode = #tpu.pipeline_mode<synchronous>, transform_indices = @transform_7, window_bounds = array<i64: 256, 128>}, {pipeline_mode = #tpu.pipeline_mode<synchronous>, transform_indices = @transform_8, window_bounds = array<i64: 8, 256>}, {transform_indices = @transform_9, window_bounds = array<i64: 16, 128>}]} {
    %c0 = arith.constant 0 : index
    %c0_0 = arith.constant 0 : index
    %0 = vector.load %arg1[%c0, %c0_0] : memref<16x128xbf16, #tpu.memory_space<vmem>>, vector<16x128xbf16>
    %c0_1 = arith.constant 0 : index
    %c0_2 = arith.constant 0 : index
    %1 = vector.load %arg2[%c0_1, %c0_2] : memref<16x128xbf16, #tpu.memory_space<vmem>>, vector<16x128xbf16>
    %c0_3 = arith.constant 0 : index
    %c0_4 = arith.constant 0 : index
    %2 = vector.load %arg3[%c0_3, %c0_4] : memref<16x128xbf16, #tpu.memory_space<vmem>>, vector<16x128xbf16>
    %c0_5 = arith.constant 0 : index
    %c0_6 = arith.constant 0 : index
    %c0_7 = arith.constant 0 : index
    %3 = vector.load %arg5[%c0_5, %c0_6, %c0_7] : memref<3x128x640xbf16, #tpu.memory_space<vmem>>, vector<1x128x640xbf16>
    %4 = vector.shape_cast %3 : vector<1x128x640xbf16> to vector<128x640xbf16>
    %cst = arith.constant dense<0.000000e+00> : vector<16x640xf32>
    %5 = tpu.matmul %0, %4, %cst {dimension_numbers = #tpu.dot_dimension_numbers<[1], [0], [0], [1], [0, 0, 1, 1], [], []>} : vector<16x128xbf16>, vector<128x640xbf16>, vector<16x640xf32> -> vector<16x640xf32>
    %6 = arith.truncf %5 : vector<16x640xf32> to vector<16x640xbf16>
    %c1 = arith.constant 1 : index
    %c0_8 = arith.constant 0 : index
    %c0_9 = arith.constant 0 : index
    %7 = vector.load %arg5[%c1, %c0_8, %c0_9] : memref<3x128x640xbf16, #tpu.memory_space<vmem>>, vector<1x128x640xbf16>
    %8 = vector.shape_cast %7 : vector<1x128x640xbf16> to vector<128x640xbf16>
    %cst_10 = arith.constant dense<0.000000e+00> : vector<16x640xf32>
    %9 = tpu.matmul %1, %8, %cst_10 {dimension_numbers = #tpu.dot_dimension_numbers<[1], [0], [0], [1], [0, 0, 1, 1], [], []>} : vector<16x128xbf16>, vector<128x640xbf16>, vector<16x640xf32> -> vector<16x640xf32>
    %10 = arith.truncf %9 : vector<16x640xf32> to vector<16x640xbf16>
    %c2 = arith.constant 2 : index
    %c0_11 = arith.constant 0 : index
    %c0_12 = arith.constant 0 : index
    %11 = vector.load %arg5[%c2, %c0_11, %c0_12] : memref<3x128x640xbf16, #tpu.memory_space<vmem>>, vector<1x128x640xbf16>
    %12 = vector.shape_cast %11 : vector<1x128x640xbf16> to vector<128x640xbf16>
    %cst_13 = arith.constant dense<0.000000e+00> : vector<16x640xf32>
    %13 = tpu.matmul %2, %12, %cst_13 {dimension_numbers = #tpu.dot_dimension_numbers<[1], [0], [0], [1], [0, 0, 1, 1], [], []>} : vector<16x128xbf16>, vector<128x640xbf16>, vector<16x640xf32> -> vector<16x640xf32>
    %14 = arith.truncf %13 : vector<16x640xf32> to vector<16x640xbf16>
    %c0_14 = arith.constant 0 : index
    %c0_15 = arith.constant 0 : index
    %15 = vector.load %arg4[%c0_14, %c0_15] : memref<16x16xf32, #tpu.memory_space<vmem>>, vector<16x16xf32>
    %16 = vector.extract_strided_slice %14 {offsets = [0, 0], sizes = [16, 128], strides = [1, 1]} : vector<16x640xbf16> to vector<16x128xbf16>
    %17 = vector.extract_strided_slice %10 {offsets = [0, 0], sizes = [16, 128], strides = [1, 1]} : vector<16x640xbf16> to vector<16x128xbf16>
    %18 = vector.extract_strided_slice %6 {offsets = [0, 0], sizes = [16, 128], strides = [1, 1]} : vector<16x640xbf16> to vector<16x128xbf16>
    %cst_16 = arith.constant dense<0.000000e+00> : vector<16x16xf32>
    %19 = tpu.matmul %16, %17, %cst_16 {dimension_numbers = #tpu.dot_dimension_numbers<[1], [1], [0], [0], [0, 0, 1, 0], [], []>} : vector<16x128xbf16>, vector<16x128xbf16>, vector<16x16xf32> -> vector<16x16xf32>
    %20 = arith.addf %19, %15 : vector<16x16xf32>
    %cst_17 = arith.constant dense<0xFF800000> : vector<16xf32>
    %21 = vector.multi_reduction <maximumf>, %20, %cst_17 [1] : vector<16x16xf32> to vector<16xf32>
    %22 = vector.shape_cast %21 : vector<16xf32> to vector<16x1xf32>
    %23 = vector.broadcast %22 : vector<16x1xf32> to vector<16x16xf32>
    %24 = arith.subf %20, %23 : vector<16x16xf32>
    %25 = math.exp %24 : vector<16x16xf32>
    %cst_18 = arith.constant dense<0.000000e+00> : vector<16xf32>
    %26 = vector.multi_reduction <add>, %25, %cst_18 [1] : vector<16x16xf32> to vector<16xf32>
    %27 = vector.shape_cast %26 : vector<16xf32> to vector<16x1xf32>
    %28 = tpu.reciprocal %27 {approx = true} : vector<16x1xf32> -> vector<16x1xf32>
    %29 = vector.broadcast %28 : vector<16x1xf32> to vector<16x16xf32>
    %30 = arith.mulf %25, %29 : vector<16x16xf32>
    %31 = arith.truncf %30 : vector<16x16xf32> to vector<16x16xbf16>
    %cst_19 = arith.constant dense<0.000000e+00> : vector<16x128xf32>
    %32 = tpu.matmul %31, %18, %cst_19 {dimension_numbers = #tpu.dot_dimension_numbers<[1], [0], [0], [1], [0, 0, 1, 1], [], []>} : vector<16x16xbf16>, vector<16x128xbf16>, vector<16x128xf32> -> vector<16x128xf32>
    %33 = arith.truncf %32 : vector<16x128xf32> to vector<16x128xbf16>
    %34 = vector.extract_strided_slice %14 {offsets = [0, 128], sizes = [16, 128], strides = [1, 1]} : vector<16x640xbf16> to vector<16x128xbf16>
    %35 = vector.extract_strided_slice %10 {offsets = [0, 128], sizes = [16, 128], strides = [1, 1]} : vector<16x640xbf16> to vector<16x128xbf16>
    %36 = vector.extract_strided_slice %6 {offsets = [0, 128], sizes = [16, 128], strides = [1, 1]} : vector<16x640xbf16> to vector<16x128xbf16>
    %cst_20 = arith.constant dense<0.000000e+00> : vector<16x16xf32>
    %37 = tpu.matmul %34, %35, %cst_20 {dimension_numbers = #tpu.dot_dimension_numbers<[1], [1], [0], [0], [0, 0, 1, 0], [], []>} : vector<16x128xbf16>, vector<16x128xbf16>, vector<16x16xf32> -> vector<16x16xf32>
    %38 = arith.addf %37, %15 : vector<16x16xf32>
    %cst_21 = arith.constant dense<0xFF800000> : vector<16xf32>
    %39 = vector.multi_reduction <maximumf>, %38, %cst_21 [1] : vector<16x16xf32> to vector<16xf32>
    %40 = vector.shape_cast %39 : vector<16xf32> to vector<16x1xf32>
    %41 = vector.broadcast %40 : vector<16x1xf32> to vector<16x16xf32>
    %42 = arith.subf %38, %41 : vector<16x16xf32>
    %43 = math.exp %42 : vector<16x16xf32>
    %cst_22 = arith.constant dense<0.000000e+00> : vector<16xf32>
    %44 = vector.multi_reduction <add>, %43, %cst_22 [1] : vector<16x16xf32> to vector<16xf32>
    %45 = vector.shape_cast %44 : vector<16xf32> to vector<16x1xf32>
    %46 = tpu.reciprocal %45 {approx = true} : vector<16x1xf32> -> vector<16x1xf32>
    %47 = vector.broadcast %46 : vector<16x1xf32> to vector<16x16xf32>
    %48 = arith.mulf %43, %47 : vector<16x16xf32>
    %49 = arith.truncf %48 : vector<16x16xf32> to vector<16x16xbf16>
    %cst_23 = arith.constant dense<0.000000e+00> : vector<16x128xf32>
    %50 = tpu.matmul %49, %36, %cst_23 {dimension_numbers = #tpu.dot_dimension_numbers<[1], [0], [0], [1], [0, 0, 1, 1], [], []>} : vector<16x16xbf16>, vector<16x128xbf16>, vector<16x128xf32> -> vector<16x128xf32>
    %51 = arith.truncf %50 : vector<16x128xf32> to vector<16x128xbf16>
    %52 = vector.extract_strided_slice %14 {offsets = [0, 256], sizes = [16, 128], strides = [1, 1]} : vector<16x640xbf16> to vector<16x128xbf16>
    %53 = vector.extract_strided_slice %10 {offsets = [0, 256], sizes = [16, 128], strides = [1, 1]} : vector<16x640xbf16> to vector<16x128xbf16>
    %54 = vector.extract_strided_slice %6 {offsets = [0, 256], sizes = [16, 128], strides = [1, 1]} : vector<16x640xbf16> to vector<16x128xbf16>
    %cst_24 = arith.constant dense<0.000000e+00> : vector<16x16xf32>
    %55 = tpu.matmul %52, %53, %cst_24 {dimension_numbers = #tpu.dot_dimension_numbers<[1], [1], [0], [0], [0, 0, 1, 0], [], []>} : vector<16x128xbf16>, vector<16x128xbf16>, vector<16x16xf32> -> vector<16x16xf32>
    %56 = arith.addf %55, %15 : vector<16x16xf32>
    %cst_25 = arith.constant dense<0xFF800000> : vector<16xf32>
    %57 = vector.multi_reduction <maximumf>, %56, %cst_25 [1] : vector<16x16xf32> to vector<16xf32>
    %58 = vector.shape_cast %57 : vector<16xf32> to vector<16x1xf32>
    %59 = vector.broadcast %58 : vector<16x1xf32> to vector<16x16xf32>
    %60 = arith.subf %56, %59 : vector<16x16xf32>
    %61 = math.exp %60 : vector<16x16xf32>
    %cst_26 = arith.constant dense<0.000000e+00> : vector<16xf32>
    %62 = vector.multi_reduction <add>, %61, %cst_26 [1] : vector<16x16xf32> to vector<16xf32>
    %63 = vector.shape_cast %62 : vector<16xf32> to vector<16x1xf32>
    %64 = tpu.reciprocal %63 {approx = true} : vector<16x1xf32> -> vector<16x1xf32>
    %65 = vector.broadcast %64 : vector<16x1xf32> to vector<16x16xf32>
    %66 = arith.mulf %61, %65 : vector<16x16xf32>
    %67 = arith.truncf %66 : vector<16x16xf32> to vector<16x16xbf16>
    %cst_27 = arith.constant dense<0.000000e+00> : vector<16x128xf32>
    %68 = tpu.matmul %67, %54, %cst_27 {dimension_numbers = #tpu.dot_dimension_numbers<[1], [0], [0], [1], [0, 0, 1, 1], [], []>} : vector<16x16xbf16>, vector<16x128xbf16>, vector<16x128xf32> -> vector<16x128xf32>
    %69 = arith.truncf %68 : vector<16x128xf32> to vector<16x128xbf16>
    %70 = vector.extract_strided_slice %14 {offsets = [0, 384], sizes = [16, 128], strides = [1, 1]} : vector<16x640xbf16> to vector<16x128xbf16>
    %71 = vector.extract_strided_slice %10 {offsets = [0, 384], sizes = [16, 128], strides = [1, 1]} : vector<16x640xbf16> to vector<16x128xbf16>
    %72 = vector.extract_strided_slice %6 {offsets = [0, 384], sizes = [16, 128], strides = [1, 1]} : vector<16x640xbf16> to vector<16x128xbf16>
    %cst_28 = arith.constant dense<0.000000e+00> : vector<16x16xf32>
    %73 = tpu.matmul %70, %71, %cst_28 {dimension_numbers = #tpu.dot_dimension_numbers<[1], [1], [0], [0], [0, 0, 1, 0], [], []>} : vector<16x128xbf16>, vector<16x128xbf16>, vector<16x16xf32> -> vector<16x16xf32>
    %74 = arith.addf %73, %15 : vector<16x16xf32>
    %cst_29 = arith.constant dense<0xFF800000> : vector<16xf32>
    %75 = vector.multi_reduction <maximumf>, %74, %cst_29 [1] : vector<16x16xf32> to vector<16xf32>
    %76 = vector.shape_cast %75 : vector<16xf32> to vector<16x1xf32>
    %77 = vector.broadcast %76 : vector<16x1xf32> to vector<16x16xf32>
    %78 = arith.subf %74, %77 : vector<16x16xf32>
    %79 = math.exp %78 : vector<16x16xf32>
    %cst_30 = arith.constant dense<0.000000e+00> : vector<16xf32>
    %80 = vector.multi_reduction <add>, %79, %cst_30 [1] : vector<16x16xf32> to vector<16xf32>
    %81 = vector.shape_cast %80 : vector<16xf32> to vector<16x1xf32>
    %82 = tpu.reciprocal %81 {approx = true} : vector<16x1xf32> -> vector<16x1xf32>
    %83 = vector.broadcast %82 : vector<16x1xf32> to vector<16x16xf32>
    %84 = arith.mulf %79, %83 : vector<16x16xf32>
    %85 = arith.truncf %84 : vector<16x16xf32> to vector<16x16xbf16>
    %cst_31 = arith.constant dense<0.000000e+00> : vector<16x128xf32>
    %86 = tpu.matmul %85, %72, %cst_31 {dimension_numbers = #tpu.dot_dimension_numbers<[1], [0], [0], [1], [0, 0, 1, 1], [], []>} : vector<16x16xbf16>, vector<16x128xbf16>, vector<16x128xf32> -> vector<16x128xf32>
    %87 = arith.truncf %86 : vector<16x128xf32> to vector<16x128xbf16>
    %88 = vector.extract_strided_slice %14 {offsets = [0, 512], sizes = [16, 128], strides = [1, 1]} : vector<16x640xbf16> to vector<16x128xbf16>
    %89 = vector.extract_strided_slice %10 {offsets = [0, 512], sizes = [16, 128], strides = [1, 1]} : vector<16x640xbf16> to vector<16x128xbf16>
    %90 = vector.extract_strided_slice %6 {offsets = [0, 512], sizes = [16, 128], strides = [1, 1]} : vector<16x640xbf16> to vector<16x128xbf16>
    %cst_32 = arith.constant dense<0.000000e+00> : vector<16x16xf32>
    %91 = tpu.matmul %88, %89, %cst_32 {dimension_numbers = #tpu.dot_dimension_numbers<[1], [1], [0], [0], [0, 0, 1, 0], [], []>} : vector<16x128xbf16>, vector<16x128xbf16>, vector<16x16xf32> -> vector<16x16xf32>
    %92 = arith.addf %91, %15 : vector<16x16xf32>
    %cst_33 = arith.constant dense<0xFF800000> : vector<16xf32>
    %93 = vector.multi_reduction <maximumf>, %92, %cst_33 [1] : vector<16x16xf32> to vector<16xf32>
    %94 = vector.shape_cast %93 : vector<16xf32> to vector<16x1xf32>
    %95 = vector.broadcast %94 : vector<16x1xf32> to vector<16x16xf32>
    %96 = arith.subf %92, %95 : vector<16x16xf32>
    %97 = math.exp %96 : vector<16x16xf32>
    %cst_34 = arith.constant dense<0.000000e+00> : vector<16xf32>
    %98 = vector.multi_reduction <add>, %97, %cst_34 [1] : vector<16x16xf32> to vector<16xf32>
    %99 = vector.shape_cast %98 : vector<16xf32> to vector<16x1xf32>
    %100 = tpu.reciprocal %99 {approx = true} : vector<16x1xf32> -> vector<16x1xf32>
    %101 = vector.broadcast %100 : vector<16x1xf32> to vector<16x16xf32>
    %102 = arith.mulf %97, %101 : vector<16x16xf32>
    %103 = arith.truncf %102 : vector<16x16xf32> to vector<16x16xbf16>
    %cst_35 = arith.constant dense<0.000000e+00> : vector<16x128xf32>
    %104 = tpu.matmul %103, %90, %cst_35 {dimension_numbers = #tpu.dot_dimension_numbers<[1], [0], [0], [1], [0, 0, 1, 1], [], []>} : vector<16x16xbf16>, vector<16x128xbf16>, vector<16x128xf32> -> vector<16x128xf32>
    %105 = arith.truncf %104 : vector<16x128xf32> to vector<16x128xbf16>
    %106 = tpu.concatenate %33, %51, %69, %87, %105 in 1 : vector<16x128xbf16>, vector<16x128xbf16>, vector<16x128xbf16>, vector<16x128xbf16>, vector<16x128xbf16> -> vector<16x640xbf16>
    %c0_36 = arith.constant 0 : index
    %c0_37 = arith.constant 0 : index
    %107 = vector.load %arg6[%c0_36, %c0_37] : memref<640x128xbf16, #tpu.memory_space<vmem>>, vector<640x128xbf16>
    %cst_38 = arith.constant dense<0.000000e+00> : vector<16x128xf32>
    %108 = tpu.matmul %106, %107, %cst_38 {dimension_numbers = #tpu.dot_dimension_numbers<[1], [0], [0], [1], [0, 0, 1, 1], [], []>} : vector<16x640xbf16>, vector<640x128xbf16>, vector<16x128xf32> -> vector<16x128xf32>
    %c0_39 = arith.constant 0 : index
    %c0_40 = arith.constant 0 : index
    %109 = vector.load %arg9[%c0_39, %c0_40] : memref<8x256xf32, #tpu.memory_space<vmem>>, vector<8x256xf32>
    %110 = vector.extract_strided_slice %109 {offsets = [0, 0], sizes = [1, 128], strides = [1, 1]} : vector<8x256xf32> to vector<1x128xf32>
    %111 = vector.extract_strided_slice %109 {offsets = [1, 0], sizes = [1, 128], strides = [1, 1]} : vector<8x256xf32> to vector<1x128xf32>
    %112 = vector.extract_strided_slice %109 {offsets = [2, 0], sizes = [1, 128], strides = [1, 1]} : vector<8x256xf32> to vector<1x128xf32>
    %113 = vector.extract_strided_slice %109 {offsets = [3, 0], sizes = [1, 256], strides = [1, 1]} : vector<8x256xf32> to vector<1x256xf32>
    %114 = vector.extract_strided_slice %109 {offsets = [4, 0], sizes = [1, 128], strides = [1, 1]} : vector<8x256xf32> to vector<1x128xf32>
    %115 = vector.extract_strided_slice %109 {offsets = [5, 0], sizes = [1, 128], strides = [1, 1]} : vector<8x256xf32> to vector<1x128xf32>
    %116 = vector.extract_strided_slice %109 {offsets = [6, 0], sizes = [1, 128], strides = [1, 1]} : vector<8x256xf32> to vector<1x128xf32>
    %117 = vector.extract_strided_slice %109 {offsets = [7, 0], sizes = [1, 128], strides = [1, 1]} : vector<8x256xf32> to vector<1x128xf32>
    %118 = vector.broadcast %110 : vector<1x128xf32> to vector<16x128xf32>
    %119 = arith.addf %108, %118 : vector<16x128xf32>
    %120 = arith.extf %2 : vector<16x128xbf16> to vector<16x128xf32>
    %121 = arith.addf %119, %120 : vector<16x128xf32>
    %cst_41 = arith.constant dense<0.000000e+00> : vector<16xf32>
    %122 = vector.multi_reduction <add>, %121, %cst_41 [1] : vector<16x128xf32> to vector<16xf32>
    %123 = vector.shape_cast %122 : vector<16xf32> to vector<16x1xf32>
    %cst_42 = arith.constant 2.000000e-02 : f32
    %124 = vector.broadcast %cst_42 : f32 to vector<16x1xf32>
    %125 = arith.mulf %123, %124 : vector<16x1xf32>
    %126 = vector.broadcast %125 : vector<16x1xf32> to vector<16x128xf32>
    %127 = arith.subf %121, %126 : vector<16x128xf32>
    %128 = vector.broadcast %117 : vector<1x128xf32> to vector<16x128xf32>
    %129 = arith.mulf %127, %128 : vector<16x128xf32>
    %130 = arith.mulf %129, %129 : vector<16x128xf32>
    %cst_43 = arith.constant dense<0.000000e+00> : vector<16xf32>
    %131 = vector.multi_reduction <add>, %130, %cst_43 [1] : vector<16x128xf32> to vector<16xf32>
    %132 = vector.shape_cast %131 : vector<16xf32> to vector<16x1xf32>
    %cst_44 = arith.constant 2.000000e-02 : f32
    %133 = vector.broadcast %cst_44 : f32 to vector<16x1xf32>
    %134 = arith.mulf %132, %133 : vector<16x1xf32>
    %cst_45 = arith.constant 9.99999974E-6 : f32
    %135 = vector.broadcast %cst_45 : f32 to vector<16x1xf32>
    %136 = arith.addf %134, %135 : vector<16x1xf32>
    %137 = math.rsqrt %136 : vector<16x1xf32>
    %138 = vector.broadcast %137 : vector<16x1xf32> to vector<16x128xf32>
    %139 = arith.mulf %129, %138 : vector<16x128xf32>
    %140 = vector.broadcast %111 : vector<1x128xf32> to vector<16x128xf32>
    %141 = arith.mulf %139, %140 : vector<16x128xf32>
    %142 = vector.broadcast %112 : vector<1x128xf32> to vector<16x128xf32>
    %143 = arith.addf %141, %142 : vector<16x128xf32>
    %144 = arith.truncf %143 : vector<16x128xf32> to vector<16x128xbf16>
    %c0_46 = arith.constant 0 : index
    %c0_47 = arith.constant 0 : index
    %145 = vector.load %arg7[%c0_46, %c0_47] : memref<128x256xbf16, #tpu.memory_space<vmem>>, vector<128x256xbf16>
    %cst_48 = arith.constant dense<0.000000e+00> : vector<16x256xf32>
    %146 = tpu.matmul %144, %145, %cst_48 {dimension_numbers = #tpu.dot_dimension_numbers<[1], [0], [0], [1], [0, 0, 1, 1], [], []>} : vector<16x128xbf16>, vector<128x256xbf16>, vector<16x256xf32> -> vector<16x256xf32>
    %147 = vector.broadcast %113 : vector<1x256xf32> to vector<16x256xf32>
    %148 = arith.addf %146, %147 : vector<16x256xf32>
    %cst_49 = arith.constant 0.000000e+00 : f32
    %149 = vector.broadcast %cst_49 : f32 to vector<16x256xf32>
    %150 = arith.maximumf %148, %149 : vector<16x256xf32>
    %151 = arith.truncf %150 : vector<16x256xf32> to vector<16x256xbf16>
    %c0_50 = arith.constant 0 : index
    %c0_51 = arith.constant 0 : index
    %152 = vector.load %arg8[%c0_50, %c0_51] : memref<256x128xbf16, #tpu.memory_space<vmem>>, vector<256x128xbf16>
    %cst_52 = arith.constant dense<0.000000e+00> : vector<16x128xf32>
    %153 = tpu.matmul %151, %152, %cst_52 {dimension_numbers = #tpu.dot_dimension_numbers<[1], [0], [0], [1], [0, 0, 1, 1], [], []>} : vector<16x256xbf16>, vector<256x128xbf16>, vector<16x128xf32> -> vector<16x128xf32>
    %154 = vector.broadcast %114 : vector<1x128xf32> to vector<16x128xf32>
    %155 = arith.addf %153, %154 : vector<16x128xf32>
    %156 = arith.addf %155, %143 : vector<16x128xf32>
    %cst_53 = arith.constant dense<0.000000e+00> : vector<16xf32>
    %157 = vector.multi_reduction <add>, %156, %cst_53 [1] : vector<16x128xf32> to vector<16xf32>
    %158 = vector.shape_cast %157 : vector<16xf32> to vector<16x1xf32>
    %cst_54 = arith.constant 2.000000e-02 : f32
    %159 = vector.broadcast %cst_54 : f32 to vector<16x1xf32>
    %160 = arith.mulf %158, %159 : vector<16x1xf32>
    %161 = vector.broadcast %160 : vector<16x1xf32> to vector<16x128xf32>
    %162 = arith.subf %156, %161 : vector<16x128xf32>
    %163 = vector.broadcast %117 : vector<1x128xf32> to vector<16x128xf32>
    %164 = arith.mulf %162, %163 : vector<16x128xf32>
    %165 = arith.mulf %164, %164 : vector<16x128xf32>
    %cst_55 = arith.constant dense<0.000000e+00> : vector<16xf32>
    %166 = vector.multi_reduction <add>, %165, %cst_55 [1] : vector<16x128xf32> to vector<16xf32>
    %167 = vector.shape_cast %166 : vector<16xf32> to vector<16x1xf32>
    %cst_56 = arith.constant 2.000000e-02 : f32
    %168 = vector.broadcast %cst_56 : f32 to vector<16x1xf32>
    %169 = arith.mulf %167, %168 : vector<16x1xf32>
    %cst_57 = arith.constant 9.99999974E-6 : f32
    %170 = vector.broadcast %cst_57 : f32 to vector<16x1xf32>
    %171 = arith.addf %169, %170 : vector<16x1xf32>
    %172 = math.rsqrt %171 : vector<16x1xf32>
    %173 = vector.broadcast %172 : vector<16x1xf32> to vector<16x128xf32>
    %174 = arith.mulf %164, %173 : vector<16x128xf32>
    %175 = vector.broadcast %115 : vector<1x128xf32> to vector<16x128xf32>
    %176 = arith.mulf %174, %175 : vector<16x128xf32>
    %177 = vector.broadcast %116 : vector<1x128xf32> to vector<16x128xf32>
    %178 = arith.addf %176, %177 : vector<16x128xf32>
    %c0_58 = arith.constant 0 : index
    %c0_59 = arith.constant 0 : index
    %179 = vector.load %arg10[%c0_58, %c0_59] : memref<16x128xf32, #tpu.memory_space<vmem>>, vector<16x128xf32>
    tpu.vector_store %arg10[%c0_58, %c0_59], %178 {strides = array<i32>} : memref<16x128xf32, #tpu.memory_space<vmem>>, vector<16x128xf32>,
    return
  }
  func.func @transform_0(%arg0: i32) -> (i32, i32) {
    %c0_i32 = arith.constant 0 : i32
    %c0_i32_0 = arith.constant 0 : i32
    return %arg0, %c0_i32 : i32, i32
  }
  func.func @transform_1(%arg0: i32) -> (i32, i32) {
    %c0_i32 = arith.constant 0 : i32
    %c0_i32_0 = arith.constant 0 : i32
    return %arg0, %c0_i32 : i32, i32
  }
  func.func @transform_2(%arg0: i32) -> (i32, i32) {
    %c0_i32 = arith.constant 0 : i32
    %c0_i32_0 = arith.constant 0 : i32
    return %arg0, %c0_i32 : i32, i32
  }
  func.func @transform_3(%arg0: i32) -> (i32, i32) {
    %c0_i32 = arith.constant 0 : i32
    %c0_i32_0 = arith.constant 0 : i32
    %c0_i32_1 = arith.constant 0 : i32
    return %c0_i32, %c0_i32_0 : i32, i32
  }
  func.func @transform_4(%arg0: i32) -> (i32, i32, i32) {
    %c0_i32 = arith.constant 0 : i32
    %c0_i32_0 = arith.constant 0 : i32
    %c0_i32_1 = arith.constant 0 : i32
    %c0_i32_2 = arith.constant 0 : i32
    return %c0_i32, %c0_i32_0, %c0_i32_1 : i32, i32, i32
  }
  func.func @transform_5(%arg0: i32) -> (i32, i32) {
    %c0_i32 = arith.constant 0 : i32
    %c0_i32_0 = arith.constant 0 : i32
    %c0_i32_1 = arith.constant 0 : i32
    return %c0_i32, %c0_i32_0 : i32, i32
  }
  func.func @transform_6(%arg0: i32) -> (i32, i32) {
    %c0_i32 = arith.constant 0 : i32
    %c0_i32_0 = arith.constant 0 : i32
    %c0_i32_1 = arith.constant 0 : i32
    return %c0_i32, %c0_i32_0 : i32, i32
  }
  func.func @transform_7(%arg0: i32) -> (i32, i32) {
    %c0_i32 = arith.constant 0 : i32
    %c0_i32_0 = arith.constant 0 : i32
    %c0_i32_1 = arith.constant 0 : i32
    return %c0_i32, %c0_i32_0 : i32, i32
  }
  func.func @transform_8(%arg0: i32) -> (i32, i32) {
    %c0_i32 = arith.constant 0 : i32
    %c0_i32_0 = arith.constant 0 : i32
    %c0_i32_1 = arith.constant 0 : i32
    return %c0_i32, %c0_i32_0 : i32, i32
  }
  func.func @transform_9(%arg0: i32) -> (i32, i32) {
    %c0_i32 = arith.constant 0 : i32
    %c0_i32_0 = arith.constant 0 : i32
    return %arg0, %c0_i32 : i32, i32
  }
}

</mosaic_0001>

<bundles_post_ra>
// kernel: transformer_block.1
= control target key start
LH: loop header
LB: loop body
LE: loop exit
PB: predicated region body
PF: predicated region fallthrough
CT: control target
= control target key end

     0   :  { %14 = vsyncpa [#allocation3], 0  ;;  %s3971_s0 = inlined_call_operand.vmem [shape: bf16[16,128], index: 0, kind: input, shape index: {}]   ;;  %s3972_s1 = inlined_call_operand.vmem [shape: bf16[16,128], index: 1, kind: input, shape index: {}]   ;;  %s3973_s2 = inlined_call_operand.vmem [shape: bf16[16,128], index: 2, kind: input, shape index: {}]   ;;  %s3974_s3 = inlined_call_operand.vmem [shape: f32[16,16], index: 3, kind: input, shape index: {}]   ;;  %s3975_s4 = inlined_call_operand.hbm [shape: bf16[3,128,640], index: 4, kind: input, shape index: {}]   ;;  %s3976_s5 = inlined_call_operand.hbm [shape: bf16[640,128], index: 5, kind: input, shape index: {}]   ;;  %s3977_s6 = inlined_call_operand.vmem [shape: bf16[128,256], index: 6, kind: input, shape index: {}]   ;;  %s3978_s7 = inlined_call_operand.hbm [shape: bf16[256,128], index: 7, kind: input, shape index: {}]   ;;  %s3979_s8 = inlined_call_operand.vmem [shape: f32[8,256], index: 8, kind: input, shape index: {}]   ;;  %s3980_s9 = inlined_call_operand.vmem [shape: f32[16,128], index: 9, kind: output, shape index: {}]  }
   0x1   :  { %15 = vsyncpa [#allocation5], 0  ;;  %s3520_s30 = smov [#allocation4]   ;;  %s3450_s13 = scalar_lea.hbm %s3976_s5, 5120 }
   0x2   :  { %s41_s10 = sshll.u32 %s3520_s30, 4  ;;  %p3451_p0 = scmp.ne.s32.totalorder %s3976_s5, %s3450_s13  ;;  %s42_s10 = int_to_ptr.vmem [resolvable:$true] %s41_s10 }
   0x3   :  { %p3454_p1 = scmp.lt.u32.totalorder %s3450_s13, %s3976_s5 }
   0x5   :  { %p3456_p2 = pnand %p3454_p1, %p3451_p0 }
   0x7   :  { %3459 = shalt.err (!%p3456_p2)
}
   0x8   :  { %s3460_s18 = scalar_lea.vmem %s42_s10, 5120  ;;  %p3465_p4 = scmp.lt.s32.totalorder %s42_s10, %s42_s10 }
   0x9   :  { %p3461_p3 = scmp.ne.s32.totalorder %s42_s10, %s3460_s18  ;;  %p3466_p5 = scmp.lt.s32.totalorder %s3460_s18, %s3460_s18 }
   0xb   :  { %p3467_p6 = por %p3466_p5, %p3465_p4 }
   0xd   :  { %p3468_p7 = pnand %p3467_p6, %p3461_p3 }
   0xf   :  { %3471 = shalt.err (!%p3468_p7)
}
  0x10   :  { %s3521_s19 = smov 64   ;;  %s3522_s20 = smov 4  }
  0x11   :  { %47 = dma.hbm_to_vmem [thread:$0]  %s3976_s5, 5120, %s42_s10, [#allocation5], %s3521_s19, %s3521_s19, %s3522_s20  }
  0x12   :  { %s3523_s23 = smov [#allocation2]   ;;  %s3472_s27 = scalar_lea.hbm %s3975_s4, 15360 }
  0x13   :  { %s29_s24 = sshll.u32 %s3523_s23, 4  ;;  %p3473_p8 = scmp.ne.s32.totalorder %s3975_s4, %s3472_s27  ;;  %s30_s24 = int_to_ptr.vmem [resolvable:$true] %s29_s24 }
  0x14   :  { %p3476_p9 = scmp.lt.u32.totalorder %s3472_s27, %s3975_s4 }
  0x16   :  { %p3478_p10 = pnand %p3476_p9, %p3473_p8 }
  0x18   :  { %3481 = shalt.err (!%p3478_p10)
}
  0x19   :  { %s3482_s12 = scalar_lea.vmem %s30_s24, 15360  ;;  %p3487_p12 = scmp.lt.s32.totalorder %s30_s24, %s30_s24 }
  0x1a   :  { %p3483_p11 = scmp.ne.s32.totalorder %s30_s24, %s3482_s12  ;;  %p3488_p13 = scmp.lt.s32.totalorder %s3482_s12, %s3482_s12 }
  0x1c   :  { %p3489_p0 = por %p3488_p13, %p3487_p12 }
  0x1e   :  { %p3490_p1 = pnand %p3489_p0, %p3483_p11 }
  0x20   :  { %3493 = shalt.err (!%p3490_p1)
}
  0x21   :  { %s3524_s5 = smov 320   ;;  %s3525_s10 = smov 20  }
  0x22   :  { %35 = dma.hbm_to_vmem [thread:$0]  %s3975_s4, 15360, %s30_s24, [#allocation3], %s3524_s5, %s3524_s5, %s3525_s10  }
  0x23   :  { %s3526_s15 = smov [#allocation6]   ;;  %s3494_s21 = scalar_lea.hbm %s3978_s7, 2048 }
  0x24   :  { %s55_s16 = sshll.u32 %s3526_s15, 4  ;;  %p3495_p2 = scmp.ne.s32.totalorder %s3978_s7, %s3494_s21  ;;  %s56_s16 = int_to_ptr.vmem [resolvable:$true] %s55_s16 }
  0x25   :  { %p3498_p3 = scmp.lt.u32.totalorder %s3494_s21, %s3978_s7 }
  0x27   :  { %p3500_p4 = pnand %p3498_p3, %p3495_p2 }
  0x29   :  { %3503 = shalt.err (!%p3500_p4)
}
  0x2a   :  { %s3504_s27 = scalar_lea.vmem %s56_s16, 2048  ;;  %p3509_p6 = scmp.lt.s32.totalorder %s56_s16, %s56_s16 }
  0x2b   :  { %p3505_p5 = scmp.ne.s32.totalorder %s56_s16, %s3504_s27  ;;  %p3510_p7 = scmp.lt.s32.totalorder %s3504_s27, %s3504_s27 }
  0x2d   :  { %p3511_p8 = por %p3510_p7, %p3509_p6 }
  0x2f   :  { %p3512_p9 = pnand %p3511_p8, %p3505_p5 }
  0x31   :  { %3515 = shalt.err (!%p3512_p9)
}
  0x32   :  { %61 = dma.hbm_to_vmem [thread:$0]  %s3978_s7, 2048, %s56_s16, [#allocation5], %s3521_s19, %s3521_s19, %s3522_s20  }
  0x33   :  { %3516 = dma.done.wait [#allocation3], 15360  }
  0x34   :  { %3517 = vsyncadd [#allocation3], 4294951936 }
  0x35   :  { %3518 = dma.done.wait [#allocation5], 7168  }
  0x36   :  { %3519 = vsyncadd [#allocation5], 4294960128  ;;  %v3527_v0 = vmov 0   ;;  %v3150_v1 = vld [vmem:[#allocation2 + $0x4] ss:$20 sps:$4 sm:$0xff]   ;;  %v3528_v28 = vmov 0.0  }
  0x37   :  { %374 = vmatprep.mubr.bf16.mxu0 %v3527_v0  ;;  %417 = vmatprep.mubr.bf16.mxu1 %v3527_v0  ;;  %v3152_v2 = vld [vmem:[#allocation2] ss:$20 sps:$4 sm:$0xff]   ;;  %v3155_v4 = vld [vmem:[#allocation2 + $0x28] ss:$20 sps:$4 sm:$0xff]   ;;  %v3158_v6 = vld [vmem:[#allocation2 + $0x50] ss:$20 sps:$4 sm:$0xff]  }
  0x38   :  { %342 = vmatprep.subr.bf16.mxu0 %v3150_v1  ;;  %v3153_v3 = vld [vmem:[#allocation2 + $0x2c] ss:$20 sps:$4 sm:$0xff]   ;;  %v3156_v5 = vld [vmem:[#allocation2 + $0x54] ss:$20 sps:$4 sm:$0xff]   ;;  %v3159_v7 = vld [vmem:[#allocation2 + $0x7c] ss:$20 sps:$4 sm:$0xff]  }
  0x39   :  { %343 = vmatpush1.bf16.msra.mxu0 %v3152_v2  ;;  %v3161_v8 = vld [vmem:[#allocation2 + $0x78] ss:$20 sps:$4 sm:$0xff]   ;;  %v3164_v10 = vld [vmem:[#allocation2 + $0xa0] ss:$20 sps:$4 sm:$0xff]   ;;  %v3167_v13 = vld [vmem:[#allocation2 + $0xc8] ss:$20 sps:$4 sm:$0xff]  }
  0x3a   :  { %344 = vmatprep.subr.bf16.mxu0 %v3153_v3  ;;  %v3162_v9 = vld [vmem:[#allocation2 + $0xa4] ss:$20 sps:$4 sm:$0xff]   ;;  %v3165_v11 = vld [vmem:[#allocation2 + $0xcc] ss:$20 sps:$4 sm:$0xff]   ;;  %v3183_v14 = vld [vmem:[#allocation2 + $0x8] ss:$20 sps:$4 sm:$0xff]  }
  0x3b   :  { %v3180_v12 = vld [vmem:[#allocation2 + $0xc] ss:$20 sps:$4 sm:$0xff]   ;;  %v3184_v15 = vld [vmem:[#allocation2 + $0x34] ss:$20 sps:$4 sm:$0xff]   ;;  %v3187_v17 = vld [vmem:[#allocation2 + $0x30] ss:$20 sps:$4 sm:$0xff]  }
  0x3c   :  { %385 = vmatprep.subr.bf16.mxu1 %v3180_v12  ;;  %v3168_v16 = vld [vmem:[#allocation2 + $0xf4] ss:$20 sps:$4 sm:$0xff]   ;;  %v3188_v18 = vld [vmem:[#allocation2 + $0x5c] ss:$20 sps:$4 sm:$0xff]   ;;  %v3191_v21 = vld [vmem:[#allocation2 + $0x58] ss:$20 sps:$4 sm:$0xff]  }
  0x3d   :  { %345 = vmatpush1.bf16.msra.mxu0 %v3155_v4  ;;  %386 = vmatpush1.bf16.msra.mxu1 %v3183_v14  ;;  %v3170_v19 = vld [vmem:[#allocation2 + $0xf0] ss:$20 sps:$4 sm:$0xff]   ;;  %v3173_v23 = vld [vmem:[#allocation2 + $0x118] ss:$20 sps:$4 sm:$0xff]   ;;  %v3197_v24 = vld [vmem:[#allocation2 + $0x80] ss:$20 sps:$4 sm:$0xff]  }
  0x3e   :  { %346 = vmatprep.subr.bf16.mxu0 %v3156_v5  ;;  %387 = vmatprep.subr.bf16.mxu1 %v3184_v15  ;;  %v3171_v20 = vld [vmem:[#allocation2 + $0x11c] ss:$20 sps:$4 sm:$0xff]   ;;  %v3195_v22 = vld [vmem:[#allocation2 + $0x84] ss:$20 sps:$4 sm:$0xff]   ;;  %v3201_v25 = vld [vmem:[#allocation2 + $0xac] ss:$20 sps:$4 sm:$0xff]  }
  0x3f   :  { %v3627_v26 = vld [vmem:[%s3971_s0] sm:$0xff]   ;;  %v3203_v29 = vld [vmem:[#allocation2 + $0xa8] ss:$20 sps:$4 sm:$0xff]   ;;  %v3176_v31 = vld [vmem:[#allocation2 + $0x38] ss:$20 sps:$4 sm:$0xff]   ;;  %vm3529_vm0 = vmmov 0  }
  0x40   :  { %v3175_v27 = vld [vmem:[#allocation2 + $0x10] ss:$20 sps:$4 sm:$0xff]   ;;  %v3207_v30 = vld [vmem:[#allocation2 + $0xd4] ss:$20 sps:$4 sm:$0xff]   ;;  %v3215_v35 = vld [vmem:[#allocation2 + $0xf8] ss:$20 sps:$4 sm:$0xff]  }
  0x41   :  { %347 = vmatpush1.bf16.msra.mxu0 %v3158_v6  ;;  %388 = vmatpush1.bf16.msra.mxu1 %v3187_v17  ;;  %v3209_v32 = vld [vmem:[#allocation2 + $0xd0] ss:$20 sps:$4 sm:$0xff]   ;;  %v3177_v34 = vld [vmem:[#allocation2 + $0x60] ss:$20 sps:$4 sm:$0xff]   ;;  %v3178_v37 = vld [vmem:[#allocation2 + $0x88] ss:$20 sps:$4 sm:$0xff]  }
  0x42   :  { %348 = vmatprep.subr.bf16.mxu0 %v3159_v7  ;;  %389 = vmatprep.subr.bf16.mxu1 %v3188_v18  ;;  %v3213_v33 = vld [vmem:[#allocation2 + $0xfc] ss:$20 sps:$4 sm:$0xff]   ;;  %v3219_v36 = vld [vmem:[#allocation2 + $0x124] ss:$20 sps:$4 sm:$0xff]   ;;  %v3221_v38 = vld [vmem:[#allocation2 + $0x120] ss:$20 sps:$4 sm:$0xff]  }
  0x43   :  { %v3227_v39 = vld [vmem:[#allocation2 + $0x144] ss:$20 sps:$4 sm:$0xff]   ;;  %v3225_v41 = vld [vmem:[#allocation2 + $0x140] ss:$20 sps:$4 sm:$0xff]   ;;  %v3231_v44 = vld [vmem:[#allocation2 + $0x168] ss:$20 sps:$4 sm:$0xff]  }
  0x44   :  { %v3179_v40 = vld [vmem:[#allocation2 + $0xb0] ss:$20 sps:$4 sm:$0xff]   ;;  %v3233_v42 = vld [vmem:[#allocation2 + $0x16c] ss:$20 sps:$4 sm:$0xff]   ;;  %v3239_v45 = vld [vmem:[#allocation2 + $0x194] ss:$20 sps:$4 sm:$0xff]  }
  0x45   :  { %349 = vmatpush1.bf16.msra.mxu0 %v3161_v8  ;;  %390 = vmatpush1.bf16.msra.mxu1 %v3191_v21  ;;  %v3182_v43 = vld [vmem:[#allocation2 + $0xd8] ss:$20 sps:$4 sm:$0xff]   ;;  %v3186_v46 = vld [vmem:[#allocation2 + $0x100] ss:$20 sps:$4 sm:$0xff]   ;;  %v3237_v47 = vld [vmem:[#allocation2 + $0x190] ss:$20 sps:$4 sm:$0xff]  }
  0x46   :  { %350 = vmatprep.subr.bf16.mxu0 %v3162_v9  ;;  %391 = vmatprep.subr.bf16.mxu1 %v3195_v22  ;;  %v3246_v48 = vld [vmem:[#allocation2 + $0x1bc] ss:$20 sps:$4 sm:$0xff]   ;;  %v3194_v50 = vld [vmem:[#allocation2 + $0x14c] ss:$20 sps:$4 sm:$0xff]   ;;  %v3252_v53 = vld [vmem:[#allocation2 + $0x1e4] ss:$20 sps:$4 sm:$0xff]  }
  0x47   :  { %v3190_v49 = vld [vmem:[#allocation2 + $0x128] ss:$20 sps:$4 sm:$0xff]   ;;  %v3244_v51 = vld [vmem:[#allocation2 + $0x1b8] ss:$20 sps:$4 sm:$0xff]   ;;  %v3250_v55 = vld [vmem:[#allocation2 + $0x1e0] ss:$20 sps:$4 sm:$0xff]  }
  0x48   :  { %v3192_v52 = vld [vmem:[#allocation2 + $0x148] ss:$20 sps:$4 sm:$0xff]   ;;  %v3258_v56 = vld [vmem:[#allocation2 + $0x20c] ss:$20 sps:$4 sm:$0xff]   ;;  %v3198_v57 = vld [vmem:[#allocation2 + $0x170] ss:$20 sps:$4 sm:$0xff]  }
  0x49   :  { %351 = vmatpush1.bf16.msra.mxu0 %v3164_v10  ;;  %392 = vmatpush1.bf16.msra.mxu1 %v3197_v24  ;;  %v3200_v54 = vld [vmem:[#allocation2 + $0x174] ss:$20 sps:$4 sm:$0xff]   ;;  %v3206_v58 = vld [vmem:[#allocation2 + $0x19c] ss:$20 sps:$4 sm:$0xff]   ;;  %v3204_v61 = vld [vmem:[#allocation2 + $0x198] ss:$20 sps:$4 sm:$0xff]  }
  0x4a   :  { %352 = vmatprep.subr.bf16.mxu0 %v3165_v11  ;;  %393 = vmatprep.subr.bf16.mxu1 %v3201_v25  ;;  %v3256_v59 = vld [vmem:[#allocation2 + $0x208] ss:$20 sps:$4 sm:$0xff]   ;;  %v3212_v62 = vld [vmem:[#allocation2 + $0x1c4] ss:$20 sps:$4 sm:$0xff]   ;;  %v3210_v2 = vld [vmem:[#allocation2 + $0x1c0] ss:$20 sps:$4 sm:$0xff]  }
  0x4b   :  { %v3264_v60 = vld [vmem:[#allocation2 + $0x234] ss:$20 sps:$4 sm:$0xff]   ;;  %v3262_v63 = vld [vmem:[#allocation2 + $0x230] ss:$20 sps:$4 sm:$0xff]   ;;  %v3218_v3 = vld [vmem:[#allocation2 + $0x1ec] ss:$20 sps:$4 sm:$0xff]  }
  0x4c   :  { %v3270_v1 = vld [vmem:[#allocation2 + $0x25c] ss:$20 sps:$4 sm:$0xff]   ;;  %v3268_v4 = vld [vmem:[#allocation2 + $0x258] ss:$20 sps:$4 sm:$0xff]   ;;  %v3224_v6 = vld [vmem:[#allocation2 + $0x214] ss:$20 sps:$4 sm:$0xff]  }
  0x4d   :  { %353 = vmatpush1.bf16.msra.mxu0 %v3167_v13  ;;  %394 = vmatpush1.bf16.msra.mxu1 %v3203_v29  ;;  %v3216_v5 = vld [vmem:[#allocation2 + $0x1e8] ss:$20 sps:$4 sm:$0xff]   ;;  %v3647_v7 = vld [vmem:[%s3972_s1] sm:$0xff]   ;;  %v3228_v10 = vld [vmem:[#allocation2 + $0x238] ss:$20 sps:$4 sm:$0xff]   ;;  %vm1307_vm1 = vcmask 130048  }
  0x4e   :  { %354 = vmatprep.subr.bf16.mxu0 %v3168_v16  ;;  %395 = vmatprep.subr.bf16.mxu1 %v3207_v30  ;;  %v3222_v8 = vld [vmem:[#allocation2 + $0x210] ss:$20 sps:$4 sm:$0xff]   ;;  %v3234_v12 = vld [vmem:[#allocation2 + $0x260] ss:$20 sps:$4 sm:$0xff]   ;;  %v3247_v16 = vld [vmem:[#allocation2 + $0x2a8] ss:$20 sps:$4 sm:$0xff]  }
  0x4f   :  { %v3230_v9 = vld [vmem:[#allocation2 + $0x23c] ss:$20 sps:$4 sm:$0xff]   ;;  %v3236_v11 = vld [vmem:[#allocation2 + $0x264] ss:$20 sps:$4 sm:$0xff]   ;;  %v3241_v14 = vld [vmem:[#allocation2 + $0x280] ss:$20 sps:$4 sm:$0xff]  }
  0x50   :  { %v3243_v13 = vld [vmem:[#allocation2 + $0x284] ss:$20 sps:$4 sm:$0xff]   ;;  %v3249_v15 = vld [vmem:[#allocation2 + $0x2ac] ss:$20 sps:$4 sm:$0xff]   ;;  %v3255_v17 = vld [vmem:[#allocation2 + $0x2d4] ss:$20 sps:$4 sm:$0xff]  }
  0x51   :  { %355 = vmatpush1.bf16.msra.mxu0 %v3170_v19  ;;  %396 = vmatpush1.bf16.msra.mxu1 %v3209_v32  ;;  %v3253_v18 = vld [vmem:[#allocation2 + $0x2d0] ss:$20 sps:$4 sm:$0xff]   ;;  %v3265_v22 = vld [vmem:[#allocation2 + $0x320] ss:$20 sps:$4 sm:$0xff]   ;;  %v3271_v24 = vld [vmem:[#allocation2 + $0x348] ss:$20 sps:$4 sm:$0xff]  }
  0x52   :  { %356 = vmatprep.subr.bf16.mxu0 %v3171_v20  ;;  %397 = vmatprep.subr.bf16.mxu1 %v3213_v33  ;;  %v3261_v19 = vld [vmem:[#allocation2 + $0x2fc] ss:$20 sps:$4 sm:$0xff]   ;;  %v3259_v20 = vld [vmem:[#allocation2 + $0x2f8] ss:$20 sps:$4 sm:$0xff]   ;;  %v3276_v25 = vld [vmem:[#allocation2 + $0x374] ss:$20 sps:$4 sm:$0xff]  }
  0x53   :  { %v3267_v21 = vld [vmem:[#allocation2 + $0x324] ss:$20 sps:$4 sm:$0xff]   ;;  %v3283_v33 = vld [vmem:[#allocation2 + $0x1a0] ss:$20 sps:$4 sm:$0xff]  }
  0x54   :  { %v3277_v29 = vld [vmem:[#allocation2 + $0x398] ss:$20 sps:$4 sm:$0xff]   ;;  %v3281_v30 = vld [vmem:[#allocation2 + $0x150] ss:$20 sps:$4 sm:$0xff]  }
  0x55   :  { %357 = vmatpush1.bf16.msra.mxu0 %v3173_v23  ;;  %398 = vmatpush1.bf16.msra.mxu1 %v3215_v35  ;;  %v3273_v23 = vld [vmem:[#allocation2 + $0x34c] ss:$20 sps:$4 sm:$0xff]   ;;  %v3285_v35 = vld [vmem:[#allocation2 + $0x1f0] ss:$20 sps:$4 sm:$0xff]  }
  0x56   :  { %3000 = vmatprep.subr.bf16.mxu0 %v3528_v28  ;;  %399 = vmatprep.subr.bf16.mxu1 %v3219_v36  ;;  %v3282_v32 = vld [vmem:[#allocation2 + $0x178] ss:$20 sps:$4 sm:$0xff]  }
  0x57   :  { %v3286_v36 = vld [vmem:[#allocation2 + $0x218] ss:$20 sps:$4 sm:$0xff]  }
  0x58   :  { %375 = vmatmul.mubr.bf16.vlgmr.msra.gmra.mrb[0].mxu0 %v3627_v26 }
  0x59   :  { %3001 = vmatpush3.bf16.msra.mxu0 %v3175_v27  ;;  %3016 = vmatprep.mubr.msk.bf16.mxu0 %vm3529_vm0, %v3528_v28  ;;  %v3279_v27 = vld [vmem:[#allocation2 + $0x39c] ss:$20 sps:$4 sm:$0xff]  }
  0x5a   :  { %3002 = vmatprep.subr.bf16.mxu0 %v3528_v28  ;;  %400 = vmatpush1.bf16.msra.mxu1 %v3221_v38  ;;  %v3288_v38 = vld [vmem:[#allocation2 + $0x268] ss:$20 sps:$4 sm:$0xff]  }
  0x5b   :  { %737 = vmatprep.subr.bf16.mxu1 %v3227_v39  ;;  %v3291_v39 = vld [vmem:[#allocation2 + $0x28c] ss:$20 sps:$4 sm:$0xff]  }
  0x5d   :  { %3003 = vmatpush3.bf16.msra.mxu0 %v3176_v31  ;;  %418 = vmatmul.mubr.bf16.vlgmr.msra.gmra.mrb[0].mxu1 %v3627_v26  ;;  %v3658_v31 = vld [vmem:[%s3973_s2] sm:$0xff]  }
  0x5e   :  { %3004 = vmatprep.subr.bf16.mxu0 %v3528_v28  ;;  %738 = vmatpush1.bf16.msra.mxu1 %v3225_v41  ;;  %v3294_v41 = vld [vmem:[#allocation2 + $0x2b4] ss:$20 sps:$4 sm:$0xff]  }
  0x5f   :  { %739 = vmatprep.subr.bf16.mxu1 %v3233_v42  ;;  %769 = vmatprep.mubr.bf16.mxu1 %v3527_v0  ;;  %v3292_v42 = vld [vmem:[#allocation2 + $0x2b0] ss:$20 sps:$4 sm:$0xff]  }
  0x61   :  { %3005 = vmatpush3.bf16.msra.mxu0 %v3177_v34  ;;  %v3284_v34 = vld [vmem:[#allocation2 + $0x1c8] ss:$20 sps:$4 sm:$0xff]  }
  0x62   :  { %3006 = vmatprep.subr.bf16.mxu0 %v3528_v28  ;;  %740 = vmatpush1.bf16.msra.mxu1 %v3231_v44  ;;  %v3295_v44 = vld [vmem:[#allocation2 + $0x2d8] ss:$20 sps:$4 sm:$0xff]  }
  0x63   :  { %741 = vmatprep.subr.bf16.mxu1 %v3239_v45  ;;  %v3300_v45 = vld [vmem:[#allocation2 + $0x304] ss:$20 sps:$4 sm:$0xff]  }
  0x65   :  { %3007 = vmatpush3.bf16.msra.mxu0 %v3178_v37  ;;  %v3287_v37 = vld [vmem:[#allocation2 + $0x240] ss:$20 sps:$4 sm:$0xff]  }
  0x66   :  { %3008 = vmatprep.subr.bf16.mxu0 %v3528_v28  ;;  %742 = vmatpush1.bf16.msra.mxu1 %v3237_v47  ;;  %v3301_v47 = vld [vmem:[#allocation2 + $0x328] ss:$20 sps:$4 sm:$0xff]  }
  0x67   :  { %743 = vmatprep.subr.bf16.mxu1 %v3246_v48  ;;  %v3303_v48 = vld [vmem:[#allocation2 + $0x32c] ss:$20 sps:$4 sm:$0xff]  }
  0x69   :  { %3009 = vmatpush3.bf16.msra.mxu0 %v3179_v40  ;;  %v3289_v40 = vld [vmem:[#allocation2 + $0x288] ss:$20 sps:$4 sm:$0xff]  }
  0x6a   :  { %3010 = vmatprep.subr.bf16.mxu0 %v3528_v28  ;;  %744 = vmatpush1.bf16.msra.mxu1 %v3244_v51  ;;  %v3309_v51 = vld [vmem:[#allocation2 + $0x37c] ss:$20 sps:$4 sm:$0xff]  }
  0x6b   :  { %745 = vmatprep.subr.bf16.mxu1 %v3252_v53  ;;  %v3312_v53 = vld [vmem:[#allocation2 + $0x3a4] ss:$20 sps:$4 sm:$0xff]  }
  0x6d   :  { %3011 = vmatpush3.bf16.msra.mxu0 %v3182_v43  ;;  %v3297_v43 = vld [vmem:[#allocation2 + $0x2dc] ss:$20 sps:$4 sm:$0xff]  }
  0x6e   :  { %3012 = vmatprep.subr.bf16.mxu0 %v3528_v28  ;;  %746 = vmatpush1.bf16.msra.mxu1 %v3250_v55  ;;  %v3313_v55 = vld [vmem:[#allocation2 + $0x290] ss:$20 sps:$4 sm:$0xff]  }
  0x6f   :  { %747 = vmatprep.subr.bf16.mxu1 %v3258_v56  ;;  %v3314_v56 = vld [vmem:[#allocation2 + $0x2b8] ss:$20 sps:$4 sm:$0xff]  }
  0x71   :  { %3013 = vmatpush3.bf16.msra.mxu0 %v3186_v46  ;;  %v3298_v46 = vld [vmem:[#allocation2 + $0x300] ss:$20 sps:$4 sm:$0xff]  }
  0x72   :  { %3014 = vmatprep.subr.bf16.mxu0 %v3528_v28  ;;  %748 = vmatpush1.bf16.msra.mxu1 %v3256_v59  ;;  %v3317_v59 = vld [vmem:[#allocation2 + $0x330] ss:$20 sps:$4 sm:$0xff]  }
  0x73   :  { %749 = vmatprep.subr.bf16.mxu1 %v3264_v60  ;;  %v3318_v60 = vld [vmem:[#allocation2 + $0x358] ss:$20 sps:$4 sm:$0xff]  }
  0x75   :  { %3015 = vmatpush3.bf16.msra.mxu0 %v3190_v49  ;;  %v3306_v49 = vld [vmem:[#allocation2 + $0x354] ss:$20 sps:$4 sm:$0xff]  }
  0x76   :  { %780 = vmatprep.subr.bf16.mxu0 %v3194_v50  ;;  %750 = vmatpush1.bf16.msra.mxu1 %v3262_v63  ;;  %v3304_v50 = vld [vmem:[#allocation2 + $0x350] ss:$20 sps:$4 sm:$0xff]   ;;  %v3320_v63 = vld [vmem:[#allocation2 + $0x3a8] ss:$20 sps:$4 sm:$0xff]  }
  0x77   :  { %751 = vmatprep.subr.bf16.mxu1 %v3270_v1 }
  0x78   :  { %3017 = vmatmul.mubr.bf16.vlgmr.msra.gmra.mrb[4].mxu0 %v3627_v26  ;;  %v3274_v26 = vld [vmem:[#allocation2 + $0x370] ss:$20 sps:$4 sm:$0xff]  }
  0x79   :  { %781 = vmatpush1.bf16.msra.mxu0 %v3192_v52  ;;  %812 = vmatprep.mubr.bf16.mxu0 %v3527_v0  ;;  %v3307_v52 = vld [vmem:[#allocation2 + $0x378] ss:$20 sps:$4 sm:$0xff]  }
  0x7a   :  { %782 = vmatprep.subr.bf16.mxu0 %v3200_v54  ;;  %752 = vmatpush1.bf16.msra.mxu1 %v3268_v4  ;;  %v3310_v54 = vld [vmem:[#allocation2 + $0x3a0] ss:$20 sps:$4 sm:$0xff]  }
  0x7b   :  { %3020 = vmatprep.subr.bf16.mxu1 %v3528_v28 }
  0x7d   :  { %783 = vmatpush1.bf16.msra.mxu0 %v3198_v57  ;;  %770 = vmatmul.mubr.bf16.vlgmr.msra.gmra.mrb[4].mxu1 %v3647_v7  ;;  %v3315_v57 = vld [vmem:[#allocation2 + $0x2e0] ss:$20 sps:$4 sm:$0xff]  }
  0x7e   :  { %784 = vmatprep.subr.bf16.mxu0 %v3206_v58  ;;  %3036 = vmatprep.mubr.msk.bf16.mxu1 %vm3529_vm0, %v3528_v28  ;;  %v3316_v58 = vld [vmem:[#allocation2 + $0x308] ss:$20 sps:$4 sm:$0xff]  }
  0x7f   :  { %3021 = vmatpush3.bf16.msra.mxu1 %v3281_v30 }
  0x80   :  { %3022 = vmatprep.subr.bf16.mxu1 %v3528_v28 }
  0x81   :  { %785 = vmatpush1.bf16.msra.mxu0 %v3204_v61  ;;  %v3319_v61 = vld [vmem:[#allocation2 + $0x380] ss:$20 sps:$4 sm:$0xff]  }
  0x82   :  { %786 = vmatprep.subr.bf16.mxu0 %v3212_v62 }
  0x83   :  { %3023 = vmatpush3.bf16.msra.mxu1 %v3282_v32 }
  0x84   :  { %3024 = vmatprep.subr.bf16.mxu1 %v3528_v28 }
  0x85   :  { %787 = vmatpush1.bf16.msra.mxu0 %v3210_v2 }
  0x86   :  { %788 = vmatprep.subr.bf16.mxu0 %v3218_v3 }
  0x87   :  { %3025 = vmatpush3.bf16.msra.mxu1 %v3283_v33 }
  0x88   :  { %3026 = vmatprep.subr.bf16.mxu1 %v3528_v28 }
  0x89   :  { %789 = vmatpush1.bf16.msra.mxu0 %v3216_v5 }
  0x8a   :  { %790 = vmatprep.subr.bf16.mxu0 %v3224_v6 }
  0x8b   :  { %3027 = vmatpush3.bf16.msra.mxu1 %v3284_v34 }
  0x8c   :  { %3028 = vmatprep.subr.bf16.mxu1 %v3528_v28 }
  0x8d   :  { %791 = vmatpush1.bf16.msra.mxu0 %v3222_v8 }
  0x8e   :  { %792 = vmatprep.subr.bf16.mxu0 %v3230_v9 }
  0x8f   :  { %3029 = vmatpush3.bf16.msra.mxu1 %v3285_v35 }
  0x90   :  { %3030 = vmatprep.subr.bf16.mxu1 %v3528_v28 }
  0x91   :  { %793 = vmatpush1.bf16.msra.mxu0 %v3228_v10 }
  0x92   :  { %794 = vmatprep.subr.bf16.mxu0 %v3236_v11 }
  0x93   :  { %3031 = vmatpush3.bf16.msra.mxu1 %v3286_v36 }
  0x94   :  { %3032 = vmatprep.subr.bf16.mxu1 %v3528_v28 }
  0x95   :  { %795 = vmatpush1.bf16.msra.mxu0 %v3234_v12 }
  0x96   :  { %1132 = vmatprep.subr.bf16.mxu0 %v3243_v13 }
  0x97   :  { %3033 = vmatpush3.bf16.msra.mxu1 %v3287_v37 }
  0x98   :  { %813 = vmatmul.mubr.bf16.vlgmr.msra.gmra.mrb[8].mxu0 %v3647_v7  ;;  %3034 = vmatprep.subr.bf16.mxu1 %v3528_v28 }
  0x99   :  { %1133 = vmatpush1.bf16.msra.mxu0 %v3241_v14  ;;  %1164 = vmatprep.mubr.bf16.mxu0 %v3527_v0 }
  0x9a   :  { %1134 = vmatprep.subr.bf16.mxu0 %v3249_v15 }
  0x9b   :  { %3035 = vmatpush3.bf16.msra.mxu1 %v3288_v38 }
  0x9c   :  { %1175 = vmatprep.subr.bf16.mxu1 %v3291_v39 }
  0x9d   :  { %1135 = vmatpush1.bf16.msra.mxu0 %v3247_v16 }
  0x9e   :  { %1136 = vmatprep.subr.bf16.mxu0 %v3255_v17  ;;  %3037 = vmatmul.mubr.bf16.vlgmr.msra.gmra.mrb[8].mxu1 %v3647_v7 }
  0x9f   :  { %1176 = vmatpush1.bf16.msra.mxu1 %v3289_v40  ;;  %1207 = vmatprep.mubr.bf16.mxu1 %v3527_v0 }
  0xa0   :  { %1177 = vmatprep.subr.bf16.mxu1 %v3294_v41 }
  0xa1   :  { %1137 = vmatpush1.bf16.msra.mxu0 %v3253_v18 }
  0xa2   :  { %1138 = vmatprep.subr.bf16.mxu0 %v3261_v19 }
  0xa3   :  { %1178 = vmatpush1.bf16.msra.mxu1 %v3292_v42 }
  0xa4   :  { %1179 = vmatprep.subr.bf16.mxu1 %v3297_v43 }
  0xa5   :  { %1139 = vmatpush1.bf16.msra.mxu0 %v3259_v20 }
  0xa6   :  { %1140 = vmatprep.subr.bf16.mxu0 %v3267_v21 }
  0xa7   :  { %1180 = vmatpush1.bf16.msra.mxu1 %v3295_v44 }
  0xa8   :  { %1181 = vmatprep.subr.bf16.mxu1 %v3300_v45 }
  0xa9   :  { %1141 = vmatpush1.bf16.msra.mxu0 %v3265_v22 }
  0xaa   :  { %1142 = vmatprep.subr.bf16.mxu0 %v3273_v23 }
  0xab   :  { %1182 = vmatpush1.bf16.msra.mxu1 %v3298_v46 }
  0xac   :  { %1183 = vmatprep.subr.bf16.mxu1 %v3303_v48  ;;  %v3749_v48 = vld [vmem:[%s3974_s3] sm:$0xff] }
  0xad   :  { %1143 = vmatpush1.bf16.msra.mxu0 %v3271_v24 }
  0xae   :  { %1144 = vmatprep.subr.bf16.mxu0 %v3276_v25 }
  0xaf   :  { %1184 = vmatpush1.bf16.msra.mxu1 %v3301_v47 }
  0xb0   :  { %1185 = vmatprep.subr.bf16.mxu1 %v3306_v49 }
  0xb1   :  { %1145 = vmatpush1.bf16.msra.mxu0 %v3274_v26 }
  0xb2   :  { %1146 = vmatprep.subr.bf16.mxu0 %v3279_v27 }
  0xb3   :  { %1186 = vmatpush1.bf16.msra.mxu1 %v3304_v50  ;;  %v3754_v50 = vld [vmem:[%s3974_s3 + $0x8] sm:$0xff] }
  0xb4   :  { %1187 = vmatprep.subr.bf16.mxu1 %v3309_v51 }
  0xb5   :  { %1147 = vmatpush1.bf16.msra.mxu0 %v3277_v29 }
  0xb6   :  { %3040 = vmatprep.subr.bf16.mxu0 %v3528_v28 }
  0xb7   :  { %1188 = vmatpush1.bf16.msra.mxu1 %v3307_v52 }
  0xb8   :  { %1165 = vmatmul.mubr.bf16.vlgmr.msra.gmra.mrb[12].mxu0 %v3658_v31  ;;  %1189 = vmatprep.subr.bf16.mxu1 %v3312_v53 }
  0xb9   :  { %3056 = vmatprep.mubr.msk.bf16.mxu0 %vm3529_vm0, %v3528_v28  ;;  %3041 = vmatpush3.bf16.msra.mxu0 %v3313_v55 }
  0xba   :  { %3042 = vmatprep.subr.bf16.mxu0 %v3528_v28 }
  0xbb   :  { %1190 = vmatpush1.bf16.msra.mxu1 %v3310_v54 }
  0xbc   :  { %3060 = vmatprep.subr.bf16.mxu1 %v3528_v28 }
  0xbd   :  { %3043 = vmatpush3.bf16.msra.mxu0 %v3314_v56 }
  0xbe   :  { %1208 = vmatmul.mubr.bf16.vlgmr.msra.gmra.mrb[12].mxu1 %v3658_v31  ;;  %3044 = vmatprep.subr.bf16.mxu0 %v3528_v28 }
  0xbf   :  { %3062 = vmatprep.mubr.msk.bf16.mxu1 %vm3529_vm0, %v3528_v28 }
  0xc1   :  { %3045 = vmatpush3.bf16.msra.mxu0 %v3315_v57 }
  0xc2   :  { %3046 = vmatprep.subr.bf16.mxu0 %v3528_v28 }
  0xc5   :  { %3047 = vmatpush3.bf16.msra.mxu0 %v3316_v58 }
  0xc6   :  { %3048 = vmatprep.subr.bf16.mxu0 %v3528_v28 }
  0xc9   :  { %3049 = vmatpush3.bf16.msra.mxu0 %v3317_v59 }
  0xca   :  { %3050 = vmatprep.subr.bf16.mxu0 %v3528_v28 }
  0xcd   :  { %3051 = vmatpush3.bf16.msra.mxu0 %v3318_v60 }
  0xce   :  { %3052 = vmatprep.subr.bf16.mxu0 %v3528_v28 }
  0xd1   :  { %3053 = vmatpush3.bf16.msra.mxu0 %v3319_v61 }
  0xd2   :  { %3054 = vmatprep.subr.bf16.mxu0 %v3528_v28 }
  0xd5   :  { %3055 = vmatpush3.bf16.msra.mxu0 %v3320_v63 }
  0xd6   :  { %3108 = vmatprep.subr.bf16.mxu0 %v3528_v28 }
  0xd8   :  { %3057 = vmatmul.mubr.bf16.vlgmr.msra.gmra.mrb[16].mxu0 %v3658_v31 }
  0xd9   :  { %3110 = vmatprep.mubr.msk.bf16.mxu0 %vm3529_vm0, %v3528_v28 }
 0x12b   :  { %v376_v62 = vpop.f32.mrb[0].mxu0 }
 0x12c   :  { %v3683_v1 = vpop.f32.mrb[1].mxu0 }
 0x12d   :  { %v380_v2 = vpop.f32.mrb[2].mxu0 }
 0x12e   :  { %v469_v3 = vpack.c.bf16 %v380_v2, %v376_v62  ;;  %v3686_v4 = vpop.f32.mrb[3].mxu0 }
 0x12f   :  { %v470_v5 = vpack.c.bf16 %v3686_v4, %v3683_v1 }
 0x130   :  { %v3694_v6 = vpop.f32.mrb[0].mxu1 }
 0x131   :  { %v3696_v7 = vpop.f32.mrb[1].mxu1 }
 0x132   :  { %v3698_v8 = vpop.f32.mrb[2].mxu1 }
 0x133   :  { %v471_v9 = vpack.c.bf16 %v3698_v8, %v3694_v6  ;;  %v3702_v10 = vpop.f32.mrb[3].mxu1 }
 0x134   :  { %v472_v11 = vpack.c.bf16 %v3702_v10, %v3696_v7 }
 0x14b   :  { %v3706_v12 = vpop.f32.mrb[4].mxu0 }
 0x14c   :  { %v3018_v13 = vpop.f32.mrb[5].mxu0 }
 0x14d   :  { %v3708_v14 = vpop.f32.mrb[6].mxu0 }
 0x14e   :  { %v473_v15 = vpack.c.bf16 %v3708_v14, %v3706_v12  ;;  %v3019_v16 = vpop.f32.mrb[7].mxu0  ;;  %v3344_v12 = vld [vmem:[#allocation4 + $0xd8] sm:$0xff]  }
 0x14f   :  { %v3346_v14 = vld [vmem:[#allocation4 + $0x98] sm:$0xff]  }
 0x150   :  { %v771_v17 = vpop.f32.mrb[4].mxu1 }
 0x151   :  { %v3712_v18 = vpop.f32.mrb[5].mxu1 }
 0x152   :  { %v775_v19 = vpop.f32.mrb[6].mxu1 }
 0x153   :  { %v864_v20 = vpack.c.bf16 %v775_v19, %v771_v17  ;;  %v3714_v21 = vpop.f32.mrb[7].mxu1 }
 0x154   :  { %v865_v22 = vpack.c.bf16 %v3714_v21, %v3712_v18 }
 0x155   :  { %3061 = vmatpush3.bf16.xpose.msra.mxu1 %v864_v20 }
 0x156   :  { %3066 = vmatprep.subr.bf16.mxu1 %v3528_v28 }
 0x16b   :  { %v3719_v23 = vpop.f32.mrb[8].mxu0 }
 0x16c   :  { %v3721_v24 = vpop.f32.mrb[9].mxu0 }
 0x16d   :  { %v3723_v25 = vpop.f32.mrb[10].mxu0 }
 0x16e   :  { %v866_v26 = vpack.c.bf16 %v3723_v25, %v3719_v23  ;;  %v3727_v27 = vpop.f32.mrb[11].mxu0  ;;  %v3335_v23 = vld [vmem:[#allocation4 + $0x78] sm:$0xff]  }
 0x16f   :  { %v867_v29 = vpack.c.bf16 %v3727_v27, %v3721_v24  ;;  %v3336_v25 = vld [vmem:[#allocation4 + $0x38] sm:$0xff]  }
 0x171   :  { %v857_v37 = vpop.f32.mrb[8].mxu1 }
 0x172   :  { %v3038_v38 = vpop.f32.mrb[9].mxu1 }
 0x173   :  { %v860_v39 = vpop.f32.mrb[10].mxu1 }
 0x174   :  { %v868_v40 = vpack.c.bf16 %v860_v39, %v857_v37  ;;  %v3039_v41 = vpop.f32.mrb[11].mxu1 }
 0x176   :  { %3109 = vmatpush3.bf16.xpose.msra.mxu0 %v868_v40 }
 0x18b   :  { %v1166_v30 = vpop.f32.mrb[12].mxu0 }
 0x18c   :  { %v1168_v32 = vpop.f32.mrb[13].mxu0 }
 0x18d   :  { %v1170_v33 = vpop.f32.mrb[14].mxu0 }
 0x18e   :  { %v1259_v34 = vpack.c.bf16 %v1170_v33, %v1166_v30  ;;  %v1172_v35 = vpop.f32.mrb[15].mxu0 }
 0x18f   :  { %v1260_v36 = vpack.c.bf16 %v1172_v35, %v1168_v32 }
 0x190   :  { %3063 = vmatmul.mubr.bf16.vlgmr.msra.gmra.mrb[16].mxu1 %v1259_v34 }
 0x191   :  { %3067 = vmatpush3.bf16.msra.mxu1 %v469_v3  ;;  %3068 = vmatprep.mubr.msk.bf16.mxu1 %vm3529_vm0, %v3528_v28  ;;  %v3734_v42 = vpop.f32.mrb[12].mxu1 }
 0x192   :  { %3072 = vmatprep.subr.bf16.mxu1 %v3528_v28  ;;  %v3736_v43 = vpop.f32.mrb[13].mxu1 }
 0x193   :  { %v3738_v44 = vpop.f32.mrb[14].mxu1 }
 0x194   :  { %v1261_v45 = vpack.c.bf16 %v3738_v44, %v3734_v42  ;;  %v3742_v46 = vpop.f32.mrb[15].mxu1 }
 0x195   :  { %v1262_v47 = vpack.c.bf16 %v3742_v46, %v3736_v43 }
 0x263   :  { %v1300_v49 = vpop.f32.mrb[16].mxu1 }
 0x264   :  { %v1301_v51 = vadd.f32 %v1300_v49, %v3749_v48  ;;  %v3064_v52 = vpop.f32.mrb[17].mxu1 }
 0x265   :  { %v1303_v53 = vpop.f32.mrb[18].mxu1 }
 0x266   :  { %v1304_v54 = vadd.f32 %v1303_v53, %v3754_v50  ;;  %v3065_v55 = vpop.f32.mrb[19].mxu1  ;;  %v1308_v56 = vsel %vm1307_vm1, %v1301_v51, -inf }
 0x267   :  { %1309 = vmax.xlane.f32.xlu0 %v1308_v56 }
 0x268   :  { %v1311_v57 = vsel %vm1307_vm1, %v1304_v54, -inf }
 0x26b   :  { %1312 = vmax.xlane.f32.xlu0 %v1311_v57 }
 0x2f4   :  { %v1310_v58 = vpop.xlane.xlu0 %1309 }
 0x2f5   :  { %v1314_v59 = vsub.f32 %v1301_v51, %v1310_v58 }
 0x2f7   :  { %v1316_v60 = vmul.f32 1.442695, %v1314_v59 }
 0x2f8   :  { %v1313_v61 = vpop.xlane.xlu0 %1312 }
 0x2f9   :  { %3402 = vpow2.f32 %v1316_v60  ;;  %v1315_v62 = vsub.f32 %v1304_v54, %v1313_v61  ;;  %v1252_v60 = vpop.f32.mrb[16].mxu0  ;;  %v3321_v61 = vld [vmem:[#allocation4 + $0x40] sm:$0xff]  }
 0x2fa   :  { %2925 = vmatprep.subr.bf16.mxu0 %v3321_v61 }
 0x2fb   :  { %v1318_v63 = vmul.f32 1.442695, %v1315_v62  ;;  %v3058_v62 = vpop.f32.mrb[17].mxu0 }
 0x2fd   :  { %3404 = vpow2.f32 %v1318_v63  ;;  %v1255_v63 = vpop.f32.mrb[18].mxu0 }
 0x303   :  { %v3403_v2 = vpop.eup %3402 }
 0x304   :  { %v1320_v3 = vsel %vm1307_vm1, %v3403_v2, 0.0 }
 0x305   :  { %1321 = vadd.xlane.f32.xlu1 %v1320_v3  ;;  %v1263_v3 = vpack.c.bf16 %v1255_v63, %v1252_v60 }
 0x307   :  { %v3405_v13 = vpop.eup %3404  ;;  %3111 = vmatmul.mubr.bf16.vlgmr.msra.gmra.mrb[20].mxu0 %v1263_v3 }
 0x308   :  { %v1323_v16 = vsel %vm1307_vm1, %v3405_v13, 0.0 }
 0x309   :  { %1324 = vadd.xlane.f32.xlu1 %v1323_v16  ;;  %v3059_v16 = vpop.f32.mrb[19].mxu0 }
 0x392   :  { %v1322_v17 = vpop.xlane.xlu1 %1321 }
 0x393   :  { %3406 = vrcp.f32 %v1322_v17  ;;  %v3324_v17 = vld [vmem:[#allocation4 + $0x8] sm:$0xff]  }
 0x396   :  { %v1325_v19 = vpop.xlane.xlu1 %1324 }
 0x397   :  { %3408 = vrcp.f32 %v1325_v19  ;;  %v3325_v19 = vld [vmem:[#allocation4 + $0x50] sm:$0xff]  }
 0x39d   :  { %v3407_v20 = vpop.eup %3406 }
 0x39e   :  { %v1328_v32 = vmul.f32 %v3407_v20, %v3403_v2  ;;  %v3322_v2 = vld [vmem:[#allocation4] sm:$0xff]   ;;  %v3326_v20 = vld [vmem:[#allocation4 + $0x10] sm:$0xff]  }
 0x39f   :  { %2926 = vmatpush3.bf16.msra.mxu0 %v3322_v2 }
 0x3a1   :  { %v3409_v30 = vpop.eup %3408 }
 0x3a2   :  { %v1329_v33 = vmul.f32 %v3409_v30, %v3405_v13  ;;  %v3323_v13 = vld [vmem:[#allocation4 + $0x48] sm:$0xff]   ;;  %v3327_v30 = vld [vmem:[#allocation4 + $0x58] sm:$0xff]  }
 0x3a3   :  { %2927 = vmatprep.subr.bf16.mxu0 %v3323_v13 }
 0x3a4   :  { %v1330_v34 = vpack.c.bf16 %v1329_v33, %v1328_v32  ;;  %2928 = vmatpush3.bf16.msra.mxu0 %v3324_v17  ;;  %v3328_v32 = vld [vmem:[#allocation4 + $0x18] sm:$0xff]   ;;  %v3329_v33 = vld [vmem:[#allocation4 + $0x60] sm:$0xff]  }
 0x3a5   :  { %2929 = vmatprep.subr.bf16.mxu0 %v3325_v19 }
 0x3a6   :  { %3069 = vmatmul.mubr.msk.bf16.vlgmr.msra.gmra.mrb[20].mxu1 %vm1307_vm1, %v1330_v34  ;;  %v3330_v34 = vld [vmem:[#allocation4 + $0x20] sm:$0xff]  }
 0x3a7   :  { %3073 = vmatpush3.bf16.xpose.msra.mxu1 %v865_v22  ;;  %3074 = vmatprep.mubr.msk.bf16.mxu1 %vm3529_vm0, %v3528_v28 }
 0x3a8   :  { %3078 = vmatprep.subr.bf16.mxu1 %v3528_v28  ;;  %2930 = vmatpush3.bf16.msra.mxu0 %v3326_v20 }
 0x3a9   :  { %2931 = vmatprep.subr.bf16.mxu0 %v3327_v30 }
 0x3ac   :  { %2932 = vmatpush3.bf16.msra.mxu0 %v3328_v32 }
 0x3ad   :  { %2933 = vmatprep.subr.bf16.mxu0 %v3329_v33 }
 0x3ae   :  { %3075 = vmatmul.mubr.bf16.vlgmr.msra.gmra.mrb[24].mxu1 %v1260_v36 }
 0x3af   :  { %3079 = vmatpush3.bf16.msra.mxu1 %v470_v5  ;;  %3080 = vmatprep.mubr.msk.bf16.mxu1 %vm3529_vm0, %v3528_v28 }
 0x3b0   :  { %3084 = vmatprep.subr.bf16.mxu1 %v3528_v28  ;;  %2934 = vmatpush3.bf16.msra.mxu0 %v3330_v34 }
 0x479   :  { %v3775_v35 = vpop.f32.mrb[20].mxu1 }
 0x47a   :  { %v3070_v37 = vpop.f32.mrb[21].mxu1 }
 0x47b   :  { %v3777_v18 = vpop.f32.mrb[22].mxu1  ;;  %v3331_v37 = vld [vmem:[#allocation4 + $0x68] sm:$0xff]  }
 0x47c   :  { %v1375_v21 = vpack.c.bf16 %v3777_v18, %v3775_v35  ;;  %v3071_v22 = vpop.f32.mrb[23].mxu1  ;;  %2935 = vmatprep.subr.bf16.mxu0 %v3331_v37 }
 0x47d   :  { %v3332_v22 = vld [vmem:[#allocation4 + $0x28] sm:$0xff]  }
 0x47e   :  { %2936 = vmatpush3.bf16.msra.mxu0 %v3332_v22 }
 0x481   :  { %v1410_v38 = vpop.f32.mrb[24].mxu1 }
 0x482   :  { %v1411_v36 = vadd.f32 %v1410_v38, %v3749_v48  ;;  %v3076_v39 = vpop.f32.mrb[25].mxu1  ;;  %v3333_v38 = vld [vmem:[#allocation4 + $0x70] sm:$0xff]  }
 0x483   :  { %v1413_v1 = vpop.f32.mrb[26].mxu1  ;;  %2937 = vmatprep.subr.bf16.mxu0 %v3333_v38 }
 0x484   :  { %v1414_v4 = vadd.f32 %v1413_v1, %v3754_v50  ;;  %v3077_v5 = vpop.f32.mrb[27].mxu1  ;;  %v1417_v40 = vsel %vm1307_vm1, %v1411_v36, -inf }
 0x485   :  { %1418 = vmax.xlane.f32.xlu0 %v1417_v40 }
 0x486   :  { %v1420_v41 = vsel %vm1307_vm1, %v1414_v4, -inf }
 0x487   :  { %1421 = vmax.xlane.f32.xlu1 %v1420_v41 }
 0x512   :  { %v1419_v49 = vpop.xlane.xlu0 %1418 }
 0x513   :  { %v1423_v51 = vsub.f32 %v1411_v36, %v1419_v49  ;;  %v3334_v36 = vld [vmem:[#allocation4 + $0x30] sm:$0xff]  }
 0x514   :  { %v1422_v52 = vpop.xlane.xlu1 %1421  ;;  %2938 = vmatpush3.bf16.msra.mxu0 %v3334_v36 }
 0x515   :  { %v1425_v53 = vmul.f32 1.442695, %v1423_v51  ;;  %v1424_v54 = vsub.f32 %v1414_v4, %v1422_v52  ;;  %2939 = vmatprep.subr.bf16.mxu0 %v3335_v23 }
 0x517   :  { %3410 = vpow2.f32 %v1425_v53  ;;  %v1427_v55 = vmul.f32 1.442695, %v1424_v54 }
 0x518   :  { %2940 = vmatpush3.bf16.msra.mxu0 %v3336_v25 }
 0x519   :  { %3412 = vpow2.f32 %v1427_v55  ;;  %3120 = vmatprep.subr.bf16.mxu0 %v3528_v28 }
 0x521   :  { %v3411_v56 = vpop.eup %3410 }
 0x522   :  { %v1429_v57 = vsel %vm1307_vm1, %v3411_v56, 0.0 }
 0x523   :  { %v3413_v58 = vpop.eup %3412  ;;  %1430 = vadd.xlane.f32.xlu0 %v1429_v57  ;;  %v1737_v57 = vpop.f32.mrb[20].mxu0 }
 0x524   :  { %v1432_v59 = vsel %vm1307_vm1, %v3413_v58, 0.0  ;;  %v3112_v35 = vpop.f32.mrb[21].mxu0  ;;  %v1738_v46 = vadd.f32 %v1737_v57, %v3749_v48 }
 0x525   :  { %1433 = vadd.xlane.f32.xlu1 %v1432_v59  ;;  %v1740_v18 = vpop.f32.mrb[22].mxu0 }
 0x526   :  { %v1744_v25 = vsel %vm1307_vm1, %v1738_v46, -inf }
 0x5b0   :  { %v1431_v39 = vpop.xlane.xlu0 %1430 }
 0x5b1   :  { %3414 = vrcp.f32 %v1431_v39 }
 0x5b2   :  { %v1434_v1 = vpop.xlane.xlu1 %1433 }
 0x5b3   :  { %3416 = vrcp.f32 %v1434_v1 }
 0x5bb   :  { %v3415_v4 = vpop.eup %3414 }
 0x5bc   :  { %v1437_v40 = vmul.f32 %v3415_v4, %v3411_v56 }
 0x5bd   :  { %v3417_v5 = vpop.eup %3416 }
 0x5be   :  { %v1438_v41 = vmul.f32 %v3417_v5, %v3413_v58 }
 0x5c0   :  { %v1439_v49 = vpack.c.bf16 %v1438_v41, %v1437_v40 }
 0x5c2   :  { %3081 = vmatmul.mubr.msk.bf16.vlgmr.msra.gmra.mrb[28].mxu1 %vm1307_vm1, %v1439_v49 }
 0x5c3   :  { %3085 = vmatpush3.bf16.xpose.msra.mxu1 %v866_v26  ;;  %3086 = vmatprep.mubr.msk.bf16.mxu1 %vm3529_vm0, %v3528_v28 }
 0x5c4   :  { %3090 = vmatprep.subr.bf16.mxu1 %v3528_v28 }
 0x5ca   :  { %3087 = vmatmul.mubr.bf16.vlgmr.msra.gmra.mrb[32].mxu1 %v1261_v45 }
 0x5cb   :  { %3091 = vmatpush3.bf16.msra.mxu1 %v471_v9  ;;  %3092 = vmatprep.mubr.msk.bf16.mxu1 %vm3529_vm0, %v3528_v28 }
 0x5cc   :  { %3096 = vmatprep.subr.bf16.mxu1 %v3528_v28 }
 0x695   :  { %v1477_v26 = vpop.f32.mrb[28].mxu1 }
 0x696   :  { %v3082_v51 = vpop.f32.mrb[29].mxu1 }
 0x697   :  { %v1480_v52 = vpop.f32.mrb[30].mxu1 }
 0x698   :  { %v1484_v42 = vpack.c.bf16 %v1480_v52, %v1477_v26  ;;  %v3083_v44 = vpop.f32.mrb[31].mxu1 }
 0x69a   :  { %2170 = vmatprep.mubr.bf16.mxu0 %v1484_v42 }
 0x69b   :  { %2171 = vmatmul.mubr.bf16.vlgmr.msra.gmra.mrb[24].mxu0 %v1375_v21  ;;  %v3113_v21 = vpop.f32.mrb[23].mxu0 }
 0x69c   :  { %3136 = vmatprep.mubr.msk.bf16.mxu0 %vm3529_vm0, %v3528_v28 }
 0x69d   :  { %v1519_v6 = vpop.f32.mrb[32].mxu1 }
 0x69e   :  { %v1520_v8 = vadd.f32 %v1519_v6, %v3749_v48  ;;  %v3088_v9 = vpop.f32.mrb[33].mxu1 }
 0x69f   :  { %v1522_v45 = vpop.f32.mrb[34].mxu1 }
 0x6a0   :  { %v1523_v53 = vadd.f32 %v1522_v45, %v3754_v50  ;;  %v3089_v54 = vpop.f32.mrb[35].mxu1  ;;  %v1526_v55 = vsel %vm1307_vm1, %v1520_v8, -inf }
 0x6a1   :  { %1527 = vmax.xlane.f32.xlu0 %v1526_v55 }
 0x6a2   :  { %v1529_v56 = vsel %vm1307_vm1, %v1523_v53, -inf }
 0x6a3   :  { %1530 = vmax.xlane.f32.xlu1 %v1529_v56 }
 0x72e   :  { %v1528_v58 = vpop.xlane.xlu0 %1527 }
 0x72f   :  { %v1532_v59 = vsub.f32 %v1520_v8, %v1528_v58 }
 0x730   :  { %v1531_v60 = vpop.xlane.xlu1 %1530 }
 0x731   :  { %v1534_v61 = vmul.f32 1.442695, %v1532_v59  ;;  %v1533_v62 = vsub.f32 %v1523_v53, %v1531_v60  ;;  %v3342_v60 = vld [vmem:[#allocation4 + $0x100] sm:$0xff]  }
 0x732   :  { %3121 = vmatpush3.bf16.msra.mxu0 %v3342_v60 }
 0x733   :  { %3418 = vpow2.f32 %v1534_v61  ;;  %v1536_v63 = vmul.f32 1.442695, %v1533_v62  ;;  %3122 = vmatprep.subr.bf16.mxu0 %v3528_v28  ;;  %v3345_v61 = vld [vmem:[#allocation4 + $0x108] sm:$0xff]   ;;  %v3348_v62 = vld [vmem:[#allocation4 + $0x110] sm:$0xff]  }
 0x735   :  { %3420 = vpow2.f32 %v1536_v63  ;;  %v3351_v63 = vld [vmem:[#allocation4 + $0x118] sm:$0xff]  }
 0x736   :  { %3123 = vmatpush3.bf16.msra.mxu0 %v3345_v61 }
 0x737   :  { %3124 = vmatprep.subr.bf16.mxu0 %v3528_v28 }
 0x73a   :  { %3125 = vmatpush3.bf16.msra.mxu0 %v3348_v62  ;;  %v2261_v62 = vunpack.c.l.bf16 %v3658_v31 }
 0x73b   :  { %3126 = vmatprep.subr.bf16.mxu0 %v3528_v28 }
 0x73d   :  { %v3419_v2 = vpop.eup %3418 }
 0x73e   :  { %v1538_v3 = vsel %vm1307_vm1, %v3419_v2, 0.0  ;;  %3127 = vmatpush3.bf16.msra.mxu0 %v3351_v63 }
 0x73f   :  { %v3421_v13 = vpop.eup %3420  ;;  %1539 = vadd.xlane.f32.xlu0 %v1538_v3  ;;  %3128 = vmatprep.subr.bf16.mxu0 %v3528_v28 }
 0x740   :  { %v1541_v16 = vsel %vm1307_vm1, %v3421_v13, 0.0 }
 0x741   :  { %1542 = vadd.xlane.f32.xlu1 %v1541_v16 }
 0x76e   :  { %v2941_v17 = vpop.f32.mrb[24].mxu0 }
 0x76f   :  { %v2942_v19 = vpop.f32.mrb[25].mxu0 }
 0x770   :  { %v3815_v20 = vadd.f32 %v2942_v19, %v2941_v17  ;;  %v2944_v30 = vpop.f32.mrb[26].mxu0 }
 0x771   :  { %v2945_v32 = vpop.f32.mrb[27].mxu0 }
 0x772   :  { %v3817_v33 = vadd.f32 %v2945_v32, %v2944_v30 }
 0x7cc   :  { %v1540_v34 = vpop.xlane.xlu0 %1539 }
 0x7cd   :  { %3422 = vrcp.f32 %v1540_v34 }
 0x7ce   :  { %v1543_v37 = vpop.xlane.xlu1 %1542 }
 0x7cf   :  { %3424 = vrcp.f32 %v1543_v37 }
 0x7d7   :  { %v3423_v22 = vpop.eup %3422 }
 0x7d8   :  { %v1546_v36 = vmul.f32 %v3423_v22, %v3419_v2  ;;  %v3354_v2 = vld [vmem:[#allocation4 + $0x120] sm:$0xff]  }
 0x7d9   :  { %v3425_v38 = vpop.eup %3424  ;;  %3129 = vmatpush3.bf16.msra.mxu0 %v3354_v2  ;;  %v3337_v22 = vld [vmem:[#allocation4 + $0xc0] sm:$0xff]  }
 0x7da   :  { %v1547_v39 = vmul.f32 %v3425_v38, %v3421_v13  ;;  %3130 = vmatprep.subr.bf16.mxu0 %v3528_v28 }
 0x7dc   :  { %v1548_v1 = vpack.c.bf16 %v1547_v39, %v1546_v36 }
 0x7de   :  { %3093 = vmatmul.mubr.msk.bf16.vlgmr.msra.gmra.mrb[36].mxu1 %vm1307_vm1, %v1548_v1 }
 0x7df   :  { %3097 = vmatpush3.bf16.xpose.msra.mxu1 %v867_v29  ;;  %3098 = vmatprep.mubr.msk.bf16.mxu1 %vm3529_vm0, %v3528_v28 }
 0x7e0   :  { %3102 = vmatprep.subr.bf16.mxu1 %v3528_v28 }
 0x7e6   :  { %3099 = vmatmul.mubr.bf16.vlgmr.msra.gmra.mrb[40].mxu1 %v1262_v47  ;;  %v1741_v47 = vadd.f32 %v1740_v18, %v3754_v50 }
 0x7e7   :  { %3103 = vmatpush3.bf16.msra.mxu1 %v472_v11  ;;  %3104 = vmatprep.mubr.msk.bf16.mxu1 %vm3529_vm0, %v3528_v28 }
 0x7e8   :  { %3114 = vmatprep.subr.bf16.mxu1 %v3528_v28  ;;  %v1747_v26 = vsel %vm1307_vm1, %v1741_v47, -inf }
 0x8b1   :  { %v3835_v24 = vpop.f32.mrb[36].mxu1 }
 0x8b2   :  { %v3094_v27 = vpop.f32.mrb[37].mxu1 }
 0x8b3   :  { %v3837_v29 = vpop.f32.mrb[38].mxu1  ;;  %v3338_v27 = vld [vmem:[#allocation4 + $0x80] sm:$0xff]  }
 0x8b4   :  { %v1593_v4 = vpack.c.bf16 %v3837_v29, %v3835_v24  ;;  %v3095_v5 = vpop.f32.mrb[39].mxu1 }
 0x8b9   :  { %v1628_v43 = vpop.f32.mrb[40].mxu1 }
 0x8ba   :  { %v1629_v7 = vadd.f32 %v1628_v43, %v3749_v48  ;;  %v3100_v10 = vpop.f32.mrb[41].mxu1  ;;  %v3339_v43 = vld [vmem:[#allocation4 + $0xc8] sm:$0xff]  }
 0x8bb   :  { %v1631_v11 = vpop.f32.mrb[42].mxu1  ;;  %v3343_v10 = vld [vmem:[#allocation4 + $0x90] sm:$0xff]  }
 0x8bc   :  { %v1632_v40 = vadd.f32 %v1631_v11, %v3754_v50  ;;  %v3101_v41 = vpop.f32.mrb[43].mxu1  ;;  %v1635_v49 = vsel %vm1307_vm1, %v1629_v7, -inf  ;;  %v3349_v11 = vld [vmem:[#allocation4 + $0xa0] sm:$0xff]  }
 0x8bd   :  { %1636 = vmax.xlane.f32.xlu0 %v1635_v49  ;;  %v3353_v41 = vld [vmem:[#allocation4 + $0xf0] sm:$0xff]  }
 0x8be   :  { %v1638_v23 = vsel %vm1307_vm1, %v1632_v40, -inf  ;;  %v3355_v49 = vld [vmem:[#allocation4 + $0xb0] sm:$0xff]  }
 0x8bf   :  { %1639 = vmax.xlane.f32.xlu1 %v1638_v23  ;;  %v3356_v23 = vld [vmem:[#allocation4 + $0xf8] sm:$0xff]  }
 0x8c1   :  { %1745 = vmax.xlane.f32.xlu0 %v1744_v25  ;;  %v3357_v25 = vld [vmem:[#allocation4 + $0x128] sm:$0xff]  }
 0x8c2   :  { %3131 = vmatpush3.bf16.msra.mxu0 %v3357_v25  ;;  %v3379_v25 = vld [vmem:[%s3977_s6 + $0x60] ss:$8 sps:$4 sm:$0xff]  }
 0x8c3   :  { %1748 = vmax.xlane.f32.xlu1 %v1747_v26  ;;  %v3358_v26 = vld [vmem:[#allocation4 + $0xb8] sm:$0xff]   ;;  %3132 = vmatprep.subr.bf16.mxu0 %v3528_v28 }
 0x94a   :  { %v1637_v48 = vpop.xlane.xlu0 %1636 }
 0x94b   :  { %v1641_v51 = vsub.f32 %v1629_v7, %v1637_v48  ;;  %v3341_v7 = vld [vmem:[#allocation4 + $0xd0] sm:$0xff]  }
 0x94c   :  { %v1640_v52 = vpop.xlane.xlu1 %1639  ;;  %v3359_v48 = vld [vmem:[#allocation4 + $0x130] sm:$0xff]  }
 0x94d   :  { %v1643_v42 = vmul.f32 1.442695, %v1641_v51  ;;  %v1642_v44 = vsub.f32 %v1632_v40, %v1640_v52  ;;  %v3352_v40 = vld [vmem:[#allocation4 + $0xa8] sm:$0xff]   ;;  %3133 = vmatpush3.bf16.msra.mxu0 %v3359_v48  ;;  %v3360_v51 = vld [vmem:[#allocation4 + $0x138] sm:$0xff]  }
 0x94e   :  { %v1746_v6 = vpop.xlane.xlu0 %1745  ;;  %3134 = vmatprep.subr.bf16.mxu0 %v3528_v28  ;;  %v3382_v48 = vld [vmem:[%s3977_s6 + $0x70] ss:$8 sps:$4 sm:$0xff]  }
 0x94f   :  { %3426 = vpow2.f32 %v1643_v42  ;;  %v1645_v50 = vmul.f32 1.442695, %v1642_v44  ;;  %v1750_v8 = vsub.f32 %v1738_v46, %v1746_v6  ;;  %v3340_v46 = vld [vmem:[#allocation4 + $0x88] sm:$0xff]  }
 0x950   :  { %v1749_v9 = vpop.xlane.xlu1 %1748 }
 0x951   :  { %3428 = vpow2.f32 %v1645_v50  ;;  %v1752_v45 = vmul.f32 1.442695, %v1750_v8  ;;  %v1751_v53 = vsub.f32 %v1741_v47, %v1749_v9  ;;  %v3350_v47 = vld [vmem:[#allocation4 + $0xe8] sm:$0xff]   ;;  %3135 = vmatpush3.bf16.msra.mxu0 %v3360_v51  ;;  %v3385_v51 = vld [vmem:[#allocation6 + $0x40] sm:$0xff]  }
 0x952   :  { %2978 = vmatprep.subr.bf16.mxu0 %v3385_v51 }
 0x953   :  { %3430 = vpow2.f32 %v1752_v45  ;;  %v1754_v54 = vmul.f32 1.442695, %v1751_v53 }
 0x955   :  { %3432 = vpow2.f32 %v1754_v54 }
 0x959   :  { %v3427_v55 = vpop.eup %3426 }
 0x95a   :  { %v1647_v56 = vsel %vm1307_vm1, %v3427_v55, 0.0 }
 0x95b   :  { %v3429_v57 = vpop.eup %3428  ;;  %1648 = vadd.xlane.f32.xlu0 %v1647_v56 }
 0x95c   :  { %v1650_v35 = vsel %vm1307_vm1, %v3429_v57, 0.0 }
 0x95d   :  { %v3431_v18 = vpop.eup %3430  ;;  %1651 = vadd.xlane.f32.xlu1 %v1650_v35 }
 0x95e   :  { %v1756_v21 = vsel %vm1307_vm1, %v3431_v18, 0.0 }
 0x95f   :  { %v3433_v58 = vpop.eup %3432  ;;  %1757 = vadd.xlane.f32.xlu0 %v1756_v21 }
 0x960   :  { %v1759_v59 = vsel %vm1307_vm1, %v3433_v58, 0.0 }
 0x961   :  { %1760 = vadd.xlane.f32.xlu1 %v1759_v59 }
 0x9e8   :  { %v1649_v3 = vpop.xlane.xlu0 %1648 }
 0x9e9   :  { %3434 = vrcp.f32 %v1649_v3 }
 0x9ea   :  { %v1652_v13 = vpop.xlane.xlu1 %1651 }
 0x9eb   :  { %3436 = vrcp.f32 %v1652_v13  ;;  %v2262_v13 = vunpack.c.h.bf16 %v3658_v31  ;;  %v3364_v31 = vld [vmem:[%s3977_s6 + $0x10] ss:$8 sps:$4 sm:$0xff]  }
 0x9ec   :  { %v1758_v16 = vpop.xlane.xlu0 %1757 }
 0x9ee   :  { %v1761_v17 = vpop.xlane.xlu1 %1760 }
 0x9ef   :  { %3438 = vrcp.f32 %v1761_v17 }
 0x9f0   :  { %3440 = vrcp.f32 %v1758_v16 }
 0x9f3   :  { %v3435_v19 = vpop.eup %3434 }
 0x9f4   :  { %v1655_v32 = vmul.f32 %v3435_v19, %v3427_v55 }
 0x9f5   :  { %v3437_v30 = vpop.eup %3436 }
 0x9f6   :  { %v1656_v34 = vmul.f32 %v3437_v30, %v3429_v57  ;;  %v3877_v57 = vld [vmem:[%s3979_s8] sm:$0xff] }
 0x9f8   :  { %v1657_v37 = vpack.c.bf16 %v1656_v34, %v1655_v32  ;;  %v3363_v32 = vld [vmem:[%s3977_s6 + $0x4] ss:$8 sps:$4 sm:$0xff]   ;;  %v3366_v34 = vld [vmem:[%s3977_s6 + $0x14] ss:$8 sps:$4 sm:$0xff]  }
 0x9f9   :  { %v3439_v38 = vpop.eup %3438 }
 0x9fa   :  { %3105 = vmatmul.mubr.msk.bf16.vlgmr.msra.gmra.mrb[44].mxu1 %vm1307_vm1, %v1657_v37  ;;  %v3441_v36 = vpop.eup %3440  ;;  %v1765_v39 = vmul.f32 %v3439_v38, %v3433_v58 }
 0x9fb   :  { %3115 = vmatpush3.bf16.msra.mxu1 %v473_v15  ;;  %3116 = vmatprep.mubr.msk.bf16.mxu1 %vm3529_vm0, %v3528_v28  ;;  %v1764_v1 = vmul.f32 %v3441_v36, %v3431_v18  ;;  %v3347_v15 = vld [vmem:[#allocation4 + $0xe0] sm:$0xff]   ;;  %v1894_v28 = vlaneseq }
 0x9fc   :  { %2947 = vmatprep.subr.bf16.mxu1 %v3337_v22 }
 0x9fd   :  { %v1766_v5 = vpack.c.bf16 %v1765_v39, %v1764_v1  ;;  %v3871_v55 = vshrl.u32 %v1894_v28, 7 }
 0x9ff   :  { %v1896_v56 = vsub.s32 0, %v3871_v55  ;;  %v2275_v37 = vsub.s32 7, %v3871_v55 }
 0xa01   :  { %v1897_v24 = vrot.slane %v3877_v57, %v1896_v56  ;;  %v3898_v36 = vrot.slane %v3877_v57, %v2275_v37 }
 0xa02   :  { %3117 = vmatmul.mubr.msk.bf16.vlgmr.msra.gmra.mrb[48].mxu1 %vm1307_vm1, %v1766_v5 }
 0xa03   :  { %2948 = vmatpush3.bf16.msra.mxu1 %v3338_v27  ;;  %v2176_v58 = vadd.f32 %v3817_v33, %v1897_v24  ;;  %v3361_v33 = vld [vmem:[%s3977_s6] ss:$8 sps:$4 sm:$0xff]  }
 0xa04   :  { %2949 = vmatprep.subr.bf16.mxu1 %v3339_v43 }
 0xa07   :  { %2950 = vmatpush3.bf16.msra.mxu1 %v3340_v46 }
 0xa08   :  { %2951 = vmatprep.subr.bf16.mxu1 %v3341_v7 }
 0xa0b   :  { %2952 = vmatpush3.bf16.msra.mxu1 %v3343_v10 }
 0xa0c   :  { %2953 = vmatprep.subr.bf16.mxu1 %v3344_v12  ;;  %v3369_v12 = vld [vmem:[%s3977_s6 + $0x24] ss:$8 sps:$4 sm:$0xff]  }
 0xa0f   :  { %2954 = vmatpush3.bf16.msra.mxu1 %v3346_v14  ;;  %v3367_v14 = vld [vmem:[%s3977_s6 + $0x20] ss:$8 sps:$4 sm:$0xff]  }
 0xa10   :  { %2955 = vmatprep.subr.bf16.mxu1 %v3347_v15  ;;  %v3372_v15 = vld [vmem:[%s3977_s6 + $0x34] ss:$8 sps:$4 sm:$0xff]  }
 0xa13   :  { %2956 = vmatpush3.bf16.msra.mxu1 %v3349_v11  ;;  %v3370_v11 = vld [vmem:[%s3977_s6 + $0x30] ss:$8 sps:$4 sm:$0xff]  }
 0xa14   :  { %2957 = vmatprep.subr.bf16.mxu1 %v3350_v47  ;;  %v3375_v47 = vld [vmem:[%s3977_s6 + $0x44] ss:$8 sps:$4 sm:$0xff]  }
 0xa17   :  { %2958 = vmatpush3.bf16.msra.mxu1 %v3352_v40  ;;  %v3373_v40 = vld [vmem:[%s3977_s6 + $0x40] ss:$8 sps:$4 sm:$0xff]  }
 0xa18   :  { %2959 = vmatprep.subr.bf16.mxu1 %v3353_v41  ;;  %v3378_v41 = vld [vmem:[%s3977_s6 + $0x54] ss:$8 sps:$4 sm:$0xff]  }
 0xa1b   :  { %2960 = vmatpush3.bf16.msra.mxu1 %v3355_v49  ;;  %v3376_v49 = vld [vmem:[%s3977_s6 + $0x50] ss:$8 sps:$4 sm:$0xff]  }
 0xa1c   :  { %2961 = vmatprep.subr.bf16.mxu1 %v3356_v23  ;;  %v3381_v23 = vld [vmem:[%s3977_s6 + $0x64] ss:$8 sps:$4 sm:$0xff]  }
 0xa1f   :  { %2962 = vmatpush3.bf16.msra.mxu1 %v3358_v26  ;;  %v3384_v26 = vld [vmem:[%s3977_s6 + $0x74] ss:$8 sps:$4 sm:$0xff]  }
 0xa20   :  { %2410 = vmatprep.subr.bf16.mxu1 %v3363_v32  ;;  %v2324_v32 = vsub.s32 3, %v3871_v55 }
 0xacd   :  { %v1695_v52 = vpop.f32.mrb[44].mxu1 }
 0xace   :  { %v3106_v42 = vpop.f32.mrb[45].mxu1 }
 0xacf   :  { %v1698_v44 = vpop.f32.mrb[46].mxu1  ;;  %v3387_v42 = vld [vmem:[#allocation6 + $0x48] sm:$0xff]  }
 0xad0   :  { %v1702_v6 = vpack.c.bf16 %v1698_v44, %v1695_v52  ;;  %v3107_v50 = vpop.f32.mrb[47].mxu1  ;;  %v3386_v52 = vld [vmem:[#allocation6] sm:$0xff]   ;;  %v3388_v44 = vld [vmem:[#allocation6 + $0x8] sm:$0xff]  }
 0xad1   :  { %v3390_v50 = vld [vmem:[#allocation6 + $0x10] sm:$0xff]  }
 0xad2   :  { %2211 = vmatprep.mubr.bf16.mxu1 %v1702_v6  ;;  %v3389_v6 = vld [vmem:[#allocation6 + $0x50] sm:$0xff]  }
 0xad3   :  { %2212 = vmatmul.mubr.bf16.vlgmr.msra.gmra.mrb[52].mxu1 %v1593_v4  ;;  %v2173_v4 = vadd.f32 %v3815_v20, %v1897_v24 }
 0xad4   :  { %2442 = vmatprep.mubr.bf16.mxu1 %v3527_v0  ;;  %2411 = vmatpush1.bf16.msra.mxu1 %v3361_v33  ;;  %v3400_v33 = vld [vmem:[#allocation6 + $0x38] sm:$0xff]  }
 0xad5   :  { %v1804_v8 = vpop.f32.mrb[48].mxu1  ;;  %2412 = vmatprep.subr.bf16.mxu1 %v3366_v34  ;;  %v1893_v34 = vld [vmem:[%s3979_s8 + $0x8] sm:$0xff] }
 0xad6   :  { %v3118_v9 = vpop.f32.mrb[49].mxu1  ;;  %v2329_v37 = vrot.slane %v1893_v34, %v2324_v32 }
 0xad7   :  { %v1807_v45 = vpop.f32.mrb[50].mxu1  ;;  %v3392_v9 = vld [vmem:[#allocation6 + $0x18] sm:$0xff]  }
 0xad8   :  { %v1811_v53 = vpack.c.bf16 %v1807_v45, %v1804_v8  ;;  %v3119_v54 = vpop.f32.mrb[51].mxu1  ;;  %2413 = vmatpush1.bf16.msra.mxu1 %v3364_v31  ;;  %v3391_v8 = vld [vmem:[#allocation6 + $0x58] sm:$0xff]   ;;  %v3393_v45 = vld [vmem:[#allocation6 + $0x60] sm:$0xff]   ;;  %v2325_v31 = vrot.slane %v3877_v57, %v2324_v32 }
 0xad9   :  { %2414 = vmatprep.subr.bf16.mxu1 %v3369_v12  ;;  %v3395_v54 = vld [vmem:[#allocation6 + $0x68] sm:$0xff]  }
 0xada   :  { %3137 = vmatmul.mubr.bf16.vlgmr.msra.gmra.mrb[28].mxu0 %v1811_v53  ;;  %v3394_v53 = vld [vmem:[#allocation6 + $0x20] sm:$0xff]  }
 0xadb   :  { %2979 = vmatpush3.bf16.msra.mxu0 %v3386_v52 }
 0xadc   :  { %2415 = vmatpush1.bf16.msra.mxu1 %v3367_v14  ;;  %2980 = vmatprep.subr.bf16.mxu0 %v3387_v42 }
 0xadd   :  { %2416 = vmatprep.subr.bf16.mxu1 %v3372_v15 }
 0xadf   :  { %2981 = vmatpush3.bf16.msra.mxu0 %v3388_v44 }
 0xae0   :  { %2417 = vmatpush1.bf16.msra.mxu1 %v3370_v11  ;;  %2982 = vmatprep.subr.bf16.mxu0 %v3389_v6 }
 0xae1   :  { %2418 = vmatprep.subr.bf16.mxu1 %v3375_v47  ;;  %v2493_v47 = vsub.s32 4, %v3871_v55 }
 0xae3   :  { %2983 = vmatpush3.bf16.msra.mxu0 %v3390_v50 }
 0xae4   :  { %2419 = vmatpush1.bf16.msra.mxu1 %v3373_v40  ;;  %2984 = vmatprep.subr.bf16.mxu0 %v3391_v8 }
 0xae5   :  { %2420 = vmatprep.subr.bf16.mxu1 %v3378_v41  ;;  %v2494_v41 = vrot.slane %v3877_v57, %v2493_v47 }
 0xae7   :  { %2985 = vmatpush3.bf16.msra.mxu0 %v3392_v9 }
 0xae8   :  { %2421 = vmatpush1.bf16.msra.mxu1 %v3376_v49  ;;  %2986 = vmatprep.subr.bf16.mxu0 %v3393_v45 }
 0xae9   :  { %2422 = vmatprep.subr.bf16.mxu1 %v3381_v23 }
 0xaeb   :  { %2987 = vmatpush3.bf16.msra.mxu0 %v3394_v53 }
 0xaec   :  { %2423 = vmatpush1.bf16.msra.mxu1 %v3379_v25  ;;  %2988 = vmatprep.subr.bf16.mxu0 %v3395_v54 }
 0xaed   :  { %2424 = vmatprep.subr.bf16.mxu1 %v3384_v26 }
 0xaf0   :  { %2425 = vmatpush1.bf16.msra.mxu1 %v3382_v48 }
 0xba6   :  { %v2963_v29 = vpop.f32.mrb[52].mxu1 }
 0xba7   :  { %v2964_v0 = vpop.f32.mrb[53].mxu1 }
 0xba8   :  { %v2965_v35 = vadd.f32 %v2964_v0, %v2963_v29  ;;  %v2966_v18 = vpop.f32.mrb[54].mxu1 }
 0xba9   :  { %v2967_v21 = vpop.f32.mrb[55].mxu1 }
 0xbaa   :  { %v2968_v59 = vadd.f32 %v2967_v21, %v2966_v18  ;;  %v2214_v60 = vadd.f32 %v2965_v35, %v2173_v4  ;;  %v2295_v35 = vsub.s32 1, %v3871_v55  ;;  %v2301_v21 = vsub.s32 2, %v3871_v55 }
 0xbac   :  { %v2217_v61 = vadd.f32 %v2968_v59, %v2176_v58  ;;  %v2296_v18 = vrot.slane %v3877_v57, %v2295_v35 }
 0xbad   :  { %v2254_v63 = vpop.f32.mrb[28].mxu0 }
 0xbae   :  { %v2255_v2 = vadd.f32 %v2254_v63, %v2214_v60  ;;  %v3138_v3 = vpop.f32.mrb[29].mxu0  ;;  %v2302_v63 = vrot.slane %v3877_v57, %v2301_v21 }
 0xbaf   :  { %v2257_v16 = vpop.f32.mrb[30].mxu0 }
 0xbb0   :  { %v2258_v17 = vadd.f32 %v2257_v16, %v2217_v61  ;;  %v3139_v19 = vpop.f32.mrb[31].mxu0  ;;  %v2263_v30 = vadd.f32 %v2261_v62, %v2255_v2 }
 0xbb1   :  { %v3397_v19 = vld [vmem:[#allocation6 + $0x70] sm:$0xff]  }
 0xbb2   :  { %2265 = vadd.xlane.f32.xlu0 %v2263_v30  ;;  %v2264_v20 = vadd.f32 %v2262_v13, %v2258_v17  ;;  %v3396_v17 = vld [vmem:[#allocation6 + $0x28] sm:$0xff]  }
 0xbb3   :  { %2989 = vmatpush3.bf16.msra.mxu0 %v3396_v17 }
 0xbb4   :  { %2267 = vadd.xlane.f32.xlu1 %v2264_v20  ;;  %2990 = vmatprep.subr.bf16.mxu0 %v3397_v19 }
 0xc3f   :  { %v2266_v22 = vpop.xlane.xlu0 %2265 }
 0xc40   :  { %v2269_v38 = vmul.f32 0.02, %v2266_v22 }
 0xc41   :  { %v2268_v39 = vpop.xlane.xlu1 %2267 }
 0xc42   :  { %v2271_v1 = vsub.f32 %v2263_v30, %v2269_v38  ;;  %v2270_v27 = vmul.f32 0.02, %v2268_v39  ;;  %v3398_v30 = vld [vmem:[#allocation6 + $0x30] sm:$0xff]  }
 0xc43   :  { %2991 = vmatpush3.bf16.msra.mxu0 %v3398_v30 }
 0xc44   :  { %v2272_v5 = vsub.f32 %v2264_v20, %v2270_v27  ;;  %v3901_v43 = vmul.f32 %v3898_v36, %v2271_v1  ;;  %v3399_v20 = vld [vmem:[#allocation6 + $0x78] sm:$0xff]  }
 0xc45   :  { %2992 = vmatprep.subr.bf16.mxu0 %v3399_v20 }
 0xc46   :  { %v2279_v46 = vmul.f32 %v3901_v43, %v3901_v43  ;;  %v3906_v7 = vmul.f32 %v3898_v36, %v2272_v5 }
 0xc47   :  { %2993 = vmatpush3.bf16.msra.mxu0 %v3400_v33 }
 0xc48   :  { %2281 = vadd.xlane.f32.xlu0 %v2279_v46  ;;  %v2280_v10 = vmul.f32 %v3906_v7, %v3906_v7 }
 0xc4a   :  { %2283 = vadd.xlane.f32.xlu1 %v2280_v10 }
 0xcd5   :  { %v2282_v28 = vpop.xlane.xlu0 %2281 }
 0xcd6   :  { %v2285_v56 = vmul.f32 0.02, %v2282_v28 }
 0xcd7   :  { %v2284_v24 = vpop.xlane.xlu1 %2283 }
 0xcd8   :  { %v2287_v29 = vadd.f32 1e-05, %v2285_v56  ;;  %v2286_v0 = vmul.f32 0.02, %v2284_v24 }
 0xcda   :  { %3442 = vrsqrt.f32 %v2287_v29  ;;  %v2288_v4 = vadd.f32 1e-05, %v2286_v0 }
 0xcdc   :  { %3444 = vrsqrt.f32 %v2288_v4 }
 0xce4   :  { %v3443_v58 = vpop.eup %3442 }
 0xce5   :  { %v2291_v59 = vmul.f32 %v3443_v58, %v3901_v43  ;;  %v2660_v58 = vsub.s32 5, %v3871_v55 }
 0xce6   :  { %v3445_v60 = vpop.eup %3444 }
 0xce7   :  { %v2292_v61 = vmul.f32 %v3445_v60, %v3906_v7  ;;  %v2297_v62 = vmul.f32 %v2296_v18, %v2291_v59  ;;  %v2666_v59 = vsub.s32 6, %v3871_v55  ;;  %v2661_v60 = vrot.slane %v3877_v57, %v2660_v58 }
 0xce9   :  { %v2298_v2 = vmul.f32 %v2296_v18, %v2292_v61  ;;  %v2303_v3 = vadd.f32 %v2302_v63, %v2297_v62 }
 0xceb   :  { %v2304_v13 = vadd.f32 %v2302_v63, %v2298_v2 }
 0xced   :  { %v2305_v16 = vpack.c.bf16 %v2304_v13, %v2303_v3 }
 0xcef   :  { %2443 = vmatmul.mubr.bf16.vlgmr.msra.gmra.mrb[56].mxu1 %v2305_v16 }
 0xdc2   :  { %v2444_v22 = vpop.f32.mrb[56].mxu1 }
 0xdc3   :  { %v2445_v38 = vadd.f32 %v2444_v22, %v2325_v31  ;;  %v2446_v39 = vpop.f32.mrb[57].mxu1 }
 0xdc4   :  { %v2447_v1 = vadd.f32 %v2446_v39, %v2329_v37  ;;  %v2448_v27 = vpop.f32.mrb[58].mxu1 }
 0xdc5   :  { %v2449_v5 = vadd.f32 %v2448_v27, %v2325_v31  ;;  %v2450_v43 = vpop.f32.mrb[59].mxu1  ;;  %v2453_v7 = vmax.f32 %v2445_v38, 0.0 }
 0xdc6   :  { %v2451_v46 = vadd.f32 %v2450_v43, %v2329_v37  ;;  %v2454_v12 = vmax.f32 %v2447_v1, 0.0 }
 0xdc7   :  { %v2455_v10 = vmax.f32 %v2449_v5, 0.0 }
 0xdc8   :  { %v2456_v14 = vmax.f32 %v2451_v46, 0.0 }
 0xdc9   :  { %v2457_v15 = vpack.c.bf16 %v2455_v10, %v2453_v7 }
 0xdca   :  { %v2458_v11 = vpack.c.bf16 %v2456_v14, %v2454_v12 }
 0xdcc   :  { %2623 = vmatprep.mubr.bf16.mxu0 %v2458_v11 }
 0xdcd   :  { %2624 = vmatmul.mubr.bf16.vlgmr.msra.gmra.mrb[32].mxu0 %v2457_v15 }
 0xea0   :  { %v2994_v40 = vpop.f32.mrb[32].mxu0 }
 0xea1   :  { %v2995_v49 = vpop.f32.mrb[33].mxu0 }
 0xea2   :  { %v2996_v23 = vadd.f32 %v2995_v49, %v2994_v40  ;;  %v2997_v25 = vpop.f32.mrb[34].mxu0 }
 0xea3   :  { %v2998_v26 = vpop.f32.mrb[35].mxu0 }
 0xea4   :  { %v2626_v48 = vadd.f32 %v2996_v23, %v2494_v41  ;;  %v2999_v51 = vadd.f32 %v2998_v26, %v2997_v25 }
 0xea6   :  { %v2629_v52 = vadd.f32 %v2999_v51, %v2494_v41  ;;  %v2632_v42 = vadd.f32 %v2626_v48, %v2303_v3 }
 0xea8   :  { %2634 = vadd.xlane.f32.xlu0 %v2632_v42  ;;  %v2633_v44 = vadd.f32 %v2629_v52, %v2304_v13 }
 0xeaa   :  { %2636 = vadd.xlane.f32.xlu1 %v2633_v44 }
 0xf35   :  { %v2635_v6 = vpop.xlane.xlu0 %2634 }
 0xf36   :  { %v2638_v50 = vmul.f32 0.02, %v2635_v6 }
 0xf37   :  { %v2637_v8 = vpop.xlane.xlu1 %2636 }
 0xf38   :  { %v2640_v9 = vsub.f32 %v2632_v42, %v2638_v50  ;;  %v2639_v45 = vmul.f32 0.02, %v2637_v8 }
 0xf3a   :  { %v2641_v53 = vsub.f32 %v2633_v44, %v2639_v45  ;;  %v2642_v54 = vmul.f32 %v2640_v9, %v3898_v36 }
 0xf3c   :  { %v2644_v28 = vmul.f32 %v2642_v54, %v2642_v54  ;;  %v2643_v56 = vmul.f32 %v2641_v53, %v3898_v36  ;;  %v2667_v36 = vrot.slane %v3877_v57, %v2666_v59 }
 0xf3e   :  { %2646 = vadd.xlane.f32.xlu0 %v2644_v28  ;;  %v2645_v24 = vmul.f32 %v2643_v56, %v2643_v56 }
 0xf40   :  { %2648 = vadd.xlane.f32.xlu1 %v2645_v24 }
 0xfcb   :  { %v2647_v29 = vpop.xlane.xlu0 %2646 }
 0xfcc   :  { %v2650_v0 = vmul.f32 0.02, %v2647_v29 }
 0xfcd   :  { %v2649_v4 = vpop.xlane.xlu1 %2648 }
 0xfce   :  { %v2652_v35 = vadd.f32 1e-05, %v2650_v0  ;;  %v2651_v18 = vmul.f32 0.02, %v2649_v4 }
 0xfd0   :  { %3446 = vrsqrt.f32 %v2652_v35  ;;  %v2653_v21 = vadd.f32 1e-05, %v2651_v18 }
 0xfd2   :  { %3448 = vrsqrt.f32 %v2653_v21 }
 0xfda   :  { %v3447_v61 = vpop.eup %3446 }
 0xfdb   :  { %v2656_v62 = vmul.f32 %v3447_v61, %v2642_v54 }
 0xfdc   :  { %v3449_v63 = vpop.eup %3448 }
 0xfdd   :  { %v2662_v2 = vmul.f32 %v2661_v60, %v2656_v62  ;;  %v2657_v3 = vmul.f32 %v3449_v63, %v2643_v56 }
 0xfdf   :  { %v2668_v13 = vadd.f32 %v2667_v36, %v2662_v2  ;;  %v2663_v16 = vmul.f32 %v2661_v60, %v2657_v3 }
 0xfe1   :  { %2670 = vst [vmem:[%s3980_s9] sm:$0xff] %v2668_v13  ;;  %v2669_v17 = vadd.f32 %v2667_v36, %v2663_v16 }
 0xfe3   :  { %2671 = vst [vmem:[%s3980_s9 + $0x8] sm:$0xff] %v2669_v17 }
 0xfe4   :  { %2676 = vsyncpa [#allocation3], 1 }
 0xfe5   :  { %2677 = vsyncpa [#allocation5], 1 }

</bundles_post_ra>
